<compile_context>
chip_gen: v5e
topology: v5e:2x2
jax: 0.10.0
libtpu: 0.0.40
codegen_flags: <defaults>
</compile_context>

<pallas_src>
import functools

import jax
import jax.numpy as jnp
from jax import lax
from jax.experimental import pallas as pl
from jax.experimental.pallas import tpu as pltpu


# ----------------------------------------------------------------------------
# Fused whole-network kernel.  NB batch elements per grid step; all activations
# stay lane-dense (channels packed with w into the 128-lane axis).
# ----------------------------------------------------------------------------
def _fused_forward_kernel(x_ref, w1k_ref, b1_ref, selhe_ref, selho_ref,
                          selwe_ref, selwo_ref, w2k_ref, b2_ref, poolh_ref,
                          rwl_ref, bl_ref, o_ref, pad1_ref, pad2_ref,
                          *, NB, H, W, CIN, C1, C2, K):
    P = K // 2
    H1, W1 = H // 2, W // 2

    # Clear the padded-activation scratch.  With the packed (w, c)-in-lanes
    # layout each pad buffer is only a few vregs, so a full clear per grid step
    # is cheaper than per-strip halo clears and stays correct when the batch
    # grid is partitioned across TensorCores ("parallel").
    pad1_ref[...] = jnp.zeros_like(pad1_ref)
    pad2_ref[...] = jnp.zeros_like(pad2_ref)

    # NB is static: the per-sample pipelines unroll into one basic block so the
    # LLO scheduler interleaves the independent chains (batch folding on
    # single-core chips); on multi-core chips NB == 1 and batch is a grid axis.
    for b in range(NB):
        # ---- Conv2d(CIN -> C1, 3x3, pad 1): 9 accumulated lane-dense dots ----
        # pad1[b, hp, wp*CIN + ci] holds the zero-padded NHWC sample.
        pad1_ref[b, pl.ds(P, H), pl.ds(P * CIN, W * CIN)] = x_ref[b]
        a1 = jnp.zeros((H, W * C1), jnp.float32)
        for kh in range(K):
            for kw in range(K):
                slab = pad1_ref[b, pl.ds(kh, H), pl.ds(kw * CIN, W * CIN)]
                a1 = a1 + jnp.dot(slab, w1k_ref[kh * K + kw],
                                  preferred_element_type=jnp.float32)
        a1 = jnp.maximum(a1 + b1_ref[...], 0.0)             # ReLU, (H, W*C1)

        # ---- MaxPool2d(2): selection matmuls (idle MXU) + VPU max -----------
        hmax = jnp.maximum(
            jnp.dot(selhe_ref[...], a1, preferred_element_type=jnp.float32),
            jnp.dot(selho_ref[...], a1, preferred_element_type=jnp.float32))
        p1 = jnp.maximum(
            jnp.dot(hmax, selwe_ref[...], preferred_element_type=jnp.float32),
            jnp.dot(hmax, selwo_ref[...], preferred_element_type=jnp.float32))
        # p1: (H1, W1*C1)

        # ---- Conv2d(C1 -> C2, 3x3, pad 1) ------------------------------------
        pad2_ref[b, pl.ds(P, H1), pl.ds(P * C1, W1 * C1)] = p1
        a2 = jnp.zeros((H1, W1 * C2), jnp.float32)
        for kh in range(K):
            for kw in range(K):
                slab = pad2_ref[b, pl.ds(kh, H1), pl.ds(kw * C1, W1 * C1)]
                a2 = a2 + jnp.dot(slab, w2k_ref[kh * K + kw],
                                  preferred_element_type=jnp.float32)
        a2 = jnp.tanh(a2 + b2_ref[...])                      # (H1, W1*C2)

        # ---- AvgPool2d(2) + Linear(W2 -> OUTF): two fused matmuls ------------
        # poolh sums h1 pairs; rwl folds (0.25 * w-pair sum) into the Linear
        # weight, yielding the lane-dense layout y[h2, c*OUTF + o] directly
        # (no in-kernel transpose / reshape in the tail).
        hs = jnp.dot(poolh_ref[...], a2, preferred_element_type=jnp.float32)
        y = jnp.dot(hs, rwl_ref[...], preferred_element_type=jnp.float32)
        y = y + bl_ref[...]

        # ---- Sigmoid: exp on EUP + exact reciprocal --------------------------
        y = pl.reciprocal(1.0 + jnp.exp(-y), approx=False)
        o_ref[b] = y.astype(o_ref.dtype)                     # (H2, C2*OUTF)


# ----------------------------------------------------------------------------
# One-time parameter preprocessing (hoisted out of the forward pass).
# `raw` uses PyTorch layouts:
#   w1: (C1, CIN, K, K)  b1: (C1,)     -- Conv2d(CIN, C1, 3, padding=1)
#   w2: (C2, C1, K, K)   b2: (C2,)     -- Conv2d(C1, C2, 3, padding=1)
#   wl: (OUTF, W2)       bl: (OUTF,)   -- Linear(W2, OUTF)
# ----------------------------------------------------------------------------
def prepare_params(raw, *, H, W):
    f32 = jnp.float32
    w1 = jnp.transpose(raw["w1"], (2, 3, 1, 0)).astype(f32)   # (K, K, CIN, C1)
    w2 = jnp.transpose(raw["w2"], (2, 3, 1, 0)).astype(f32)   # (K, K, C1, C2)
    wl = jnp.transpose(raw["wl"]).astype(f32)                 # (W2, OUTF)
    K, _, CIN, C1 = w1.shape
    C2 = w2.shape[-1]
    OUTF = wl.shape[-1]
    H1, W1 = H // 2, W // 2

    eye_w = jnp.eye(W, dtype=f32)
    eye_w1 = jnp.eye(W1, dtype=f32)
    eye_c1 = jnp.eye(C1, dtype=f32)
    eye_c2 = jnp.eye(C2, dtype=f32)
    eye_h = jnp.eye(H, dtype=f32)
    eye_h1 = jnp.eye(H1, dtype=f32)

    # Block-diagonal conv weights:
    #   w1k[kh*K+kw][w'*CIN + ci, w*C1 + co] = (w' == w) * w1[kh, kw, ci, co]
    w1k = jnp.stack([jnp.kron(eye_w, w1[kh, kw])
                     for kh in range(K) for kw in range(K)])   # (K*K, W*CIN, W*C1)
    w2k = jnp.stack([jnp.kron(eye_w1, w2[kh, kw])
                     for kh in range(K) for kw in range(K)])   # (K*K, W1*C1, W1*C2)
    b1_big = jnp.tile(raw["b1"].astype(f32).reshape(1, C1), (1, W))    # (1, W*C1)
    b2_big = jnp.tile(raw["b2"].astype(f32).reshape(1, C2), (1, W1))   # (1, W1*C2)

    # MaxPool2d(2) selection matrices (pooling realised as matmul + max).
    sel_h_even = eye_h[0::2]                                   # (H1, H)
    sel_h_odd = eye_h[1::2]
    sel_w_even = jnp.kron(eye_w[:, 0::2], eye_c1)              # (W*C1, W1*C1)
    sel_w_odd = jnp.kron(eye_w[:, 1::2], eye_c1)

    # AvgPool2d(2) + Linear: h-pair sum on the left; (0.25 * w-pair sum) folded
    # into the Linear weight on the right -> lane-dense (H2, C2*OUTF) output.
    pool_h = eye_h1[0::2] + eye_h1[1::2]                       # (H2, H1)
    v = 0.25 * jnp.repeat(wl, 2, axis=0)                       # (W1, OUTF)
    rwl = jnp.einsum("wo,cd->wcdo", v, eye_c2).reshape(W1 * C2, C2 * OUTF)
    bl_big = jnp.tile(raw["bl"].astype(f32).reshape(1, OUTF), (1, C2))  # (1, C2*OUTF)

    return {"w1k": w1k, "b1": b1_big,
            "sel_h_even": sel_h_even, "sel_h_odd": sel_h_odd,
            "sel_w_even": sel_w_even, "sel_w_odd": sel_w_odd,
            "w2k": w2k, "b2": b2_big,
            "pool_h": pool_h, "rwl": rwl, "bl": bl_big}


def _fold_batch_by_default():
    """Fold the batch into one grid step on single-TensorCore chips (v5e/v6e)."""
    try:
        kind = jax.devices()[0].device_kind.lower()
    except Exception:
        return False
    return any(t in kind for t in
               ("v5e", "v5 lite", "v5lite", "v6e", "v6 lite", "v6lite"))


# ----------------------------------------------------------------------------
# NNModel.forward equivalent (single fused pallas_call).
# ----------------------------------------------------------------------------
def nn_model_forward(x_nchw, prep, *, batch_block=None):
    N, CIN, H, W = x_nchw.shape
    K = int(round(prep["w1k"].shape[0] ** 0.5))
    C1 = prep["w1k"].shape[2] // W
    H1, W1 = H // 2, W // 2
    C2 = prep["w2k"].shape[2] // W1
    H2 = H1 // 2
    OUTF = prep["bl"].shape[1] // C2
    P = K // 2

    if batch_block is None:
        batch_block = N if _fold_batch_by_default() else 1
    NB = max(1, min(N, batch_block))
    assert N % NB == 0

    # Pack (w, c) into the lane axis: x_packed[n, h, w*CIN + ci].
    # TODO(synk): this single NCHW->packed transpose stays in the wrapper;
    # folding it into the kernel would require strided lane stores for a
    # marginal gain.
    x_packed = jnp.transpose(x_nchw, (0, 2, 3, 1)).reshape(N, H, W * CIN)

    kern = functools.partial(_fused_forward_kernel, NB=NB, H=H, W=W,
                             CIN=CIN, C1=C1, C2=C2, K=K)
    whole2 = lambda g: (0, 0)
    whole3 = lambda g: (0, 0, 0)

    out = pl.pallas_call(
        kern,
        out_shape=jax.ShapeDtypeStruct((N, H2, C2 * OUTF), x_nchw.dtype),
        grid=(N // NB,),
        in_specs=[
            pl.BlockSpec((NB, H, W * CIN), lambda g: (g, 0, 0)),
            pl.BlockSpec((K * K, W * CIN, W * C1), whole3),
            pl.BlockSpec((1, W * C1), whole2),
            pl.BlockSpec((H1, H), whole2),
            pl.BlockSpec((H1, H), whole2),
            pl.BlockSpec((W * C1, W1 * C1), whole2),
            pl.BlockSpec((W * C1, W1 * C1), whole2),
            pl.BlockSpec((K * K, W1 * C1, W1 * C2), whole3),
            pl.BlockSpec((1, W1 * C2), whole2),
            pl.BlockSpec((H2, H1), whole2),
            pl.BlockSpec((W1 * C2, C2 * OUTF), whole2),
            pl.BlockSpec((1, C2 * OUTF), whole2),
        ],
        out_specs=pl.BlockSpec((NB, H2, C2 * OUTF), lambda g: (g, 0, 0)),
        scratch_shapes=[
            pltpu.VMEM((NB, H + 2 * P, (W + 2 * P) * CIN), jnp.float32),   # pad1
            pltpu.VMEM((NB, H1 + 2 * P, (W1 + 2 * P) * C1), jnp.float32),  # pad2
        ],
        compiler_params=pltpu.CompilerParams(dimension_semantics=("parallel",)),
    )(x_packed, prep["w1k"], prep["b1"], prep["sel_h_even"], prep["sel_h_odd"],
      prep["sel_w_even"], prep["sel_w_odd"], prep["w2k"], prep["b2"],
      prep["pool_h"], prep["rwl"], prep["bl"])

    # (N, H2, C2*OUTF) -> (N, C2, H2, OUTF): one tiny layout-plumbing transpose
    # on the 16 KB output; everything upstream stayed lane-dense in VMEM.
    return jnp.transpose(out.reshape(N, H2, C2, OUTF), (0, 2, 1, 3))


# ----------------------------------------------------------------------------
# Pure-JAX reference (for numerical validation only).
# ----------------------------------------------------------------------------
def reference_forward(x_nchw, raw):
    dn = ("NHWC", "HWIO", "NHWC")
    w1 = jnp.transpose(raw["w1"], (2, 3, 1, 0))
    w2 = jnp.transpose(raw["w2"], (2, 3, 1, 0))
    x = jnp.transpose(x_nchw, (0, 2, 3, 1))
    x = lax.conv_general_dilated(x, w1, (1, 1), [(1, 1), (1, 1)],
                                 dimension_numbers=dn) + raw["b1"]
    x = jnp.maximum(x, 0.0)
    x = lax.reduce_window(x, -jnp.inf, lax.max, (1, 2, 2, 1), (1, 2, 2, 1), "VALID")
    x = lax.conv_general_dilated(x, w2, (1, 1), [(1, 1), (1, 1)],
                                 dimension_numbers=dn) + raw["b2"]
    x = jnp.tanh(x)
    x = lax.reduce_window(x, 0.0, lax.add, (1, 2, 2, 1), (1, 2, 2, 1), "VALID") * 0.25
    x = jnp.transpose(x, (0, 3, 1, 2))                         # (N, C2, H2, W2)
    y = jnp.einsum("nchw,ow->ncho", x, raw["wl"]) + raw["bl"]  # PyTorch Linear
    return 1.0 / (1.0 + jnp.exp(-y))


if __name__ == "__main__":
    key = jax.random.PRNGKey(0)
    ks = jax.random.split(key, 7)

    N, CIN, H, W = 2, 4, 16, 16
    x = jax.random.normal(ks[0], (N, CIN, H, W), jnp.float32)

    # Raw parameters in PyTorch layouts (Conv2d OIHW, Linear (out, in)).
    raw = {
        "w1": jax.random.normal(ks[1], (8, CIN, 3, 3), jnp.float32) * 0.1,
        "b1": jax.random.normal(ks[2], (8,), jnp.float32) * 0.1,
        "w2": jax.random.normal(ks[3], (16, 8, 3, 3), jnp.float32) * 0.05,
        "b2": jax.random.normal(ks[4], (16,), jnp.float32) * 0.1,
        "wl": jax.random.normal(ks[5], (32, 4), jnp.float32) * 0.2,
        "bl": jax.random.normal(ks[6], (32,), jnp.float32) * 0.1,
    }

    prep = prepare_params(raw, H=H, W=W)        # one-time weight preprocessing
    forward = jax.jit(nn_model_forward)

    y = jax.block_until_ready(forward(x, prep))
    assert y.shape == (2, 16, 4, 32), y.shape

    y_ref = reference_forward(x, raw)
    err = float(jnp.max(jnp.abs(y - y_ref)))
    assert jnp.allclose(y, y_ref, atol=1e-4, rtol=1e-4), err

    print("KERNEL_OK")
</pallas_src>

<mosaic_0001>
module attributes {stable_mosaic.version = 11 : i64} {
  func.func @_fused_forward_kernel(%arg0: i32, %arg1: memref<1x16x64xf32, #tpu.memory_space<vmem>>, %arg2: memref<9x64x128xf32, #tpu.memory_space<vmem>>, %arg3: memref<1x128xf32, #tpu.memory_space<vmem>>, %arg4: memref<8x16xf32, #tpu.memory_space<vmem>>, %arg5: memref<8x16xf32, #tpu.memory_space<vmem>>, %arg6: memref<128x64xf32, #tpu.memory_space<vmem>>, %arg7: memref<128x64xf32, #tpu.memory_space<vmem>>, %arg8: memref<9x64x128xf32, #tpu.memory_space<vmem>>, %arg9: memref<1x128xf32, #tpu.memory_space<vmem>>, %arg10: memref<4x8xf32, #tpu.memory_space<vmem>>, %arg11: memref<128x512xf32, #tpu.memory_space<vmem>>, %arg12: memref<1x512xf32, #tpu.memory_space<vmem>>, %arg13: memref<1x4x512xf32, #tpu.memory_space<vmem>>, %arg14: memref<1x18x72xf32, #tpu.memory_space<vmem>>, %arg15: memref<1x10x80xf32, #tpu.memory_space<vmem>>) attributes {dimension_semantics = [#tpu.dimension_semantics<parallel>], iteration_bounds = array<i64: 2>, scalar_prefetch = 0 : i64, scratch_operands = 2 : i64, tpu.core_type = #tpu.core_type<tc>, window_params = [{transform_indices = @transform_0, window_bounds = array<i64: 1, 16, 64>}, {pipeline_mode = #tpu.pipeline_mode<synchronous>, transform_indices = @transform_1, window_bounds = array<i64: 9, 64, 128>}, {pipeline_mode = #tpu.pipeline_mode<synchronous>, transform_indices = @transform_2, window_bounds = array<i64: 1, 128>}, {pipeline_mode = #tpu.pipeline_mode<synchronous>, transform_indices = @transform_3, window_bounds = array<i64: 8, 16>}, {pipeline_mode = #tpu.pipeline_mode<synchronous>, transform_indices = @transform_4, window_bounds = array<i64: 8, 16>}, {pipeline_mode = #tpu.pipeline_mode<synchronous>, transform_indices = @transform_5, window_bounds = array<i64: 128, 64>}, {pipeline_mode = #tpu.pipeline_mode<synchronous>, transform_indices = @transform_6, window_bounds = array<i64: 128, 64>}, {pipeline_mode = #tpu.pipeline_mode<synchronous>, transform_indices = @transform_7, window_bounds = array<i64: 9, 64, 128>}, {pipeline_mode = #tpu.pipeline_mode<synchronous>, transform_indices = @transform_8, window_bounds = array<i64: 1, 128>}, {pipeline_mode = #tpu.pipeline_mode<synchronous>, transform_indices = @transform_9, window_bounds = array<i64: 4, 8>}, {pipeline_mode = #tpu.pipeline_mode<synchronous>, transform_indices = @transform_10, window_bounds = array<i64: 128, 512>}, {pipeline_mode = #tpu.pipeline_mode<synchronous>, transform_indices = @transform_11, window_bounds = array<i64: 1, 512>}, {transform_indices = @transform_12, window_bounds = array<i64: 1, 4, 512>}]} {
    %cst = arith.constant 0.000000e+00 : f32
    %0 = vector.broadcast %cst : f32 to vector<1x18x72xf32>
    %c0 = arith.constant 0 : index
    %c0_0 = arith.constant 0 : index
    %c0_1 = arith.constant 0 : index
    %1 = vector.load %arg14[%c0, %c0_0, %c0_1] : memref<1x18x72xf32, #tpu.memory_space<vmem>>, vector<1x18x72xf32>
    tpu.vector_store %arg14[%c0, %c0_0, %c0_1], %0 {strides = array<i32>} : memref<1x18x72xf32, #tpu.memory_space<vmem>>, vector<1x18x72xf32>,
    %cst_2 = arith.constant 0.000000e+00 : f32
    %2 = vector.broadcast %cst_2 : f32 to vector<1x10x80xf32>
    %c0_3 = arith.constant 0 : index
    %c0_4 = arith.constant 0 : index
    %c0_5 = arith.constant 0 : index
    %3 = vector.load %arg15[%c0_3, %c0_4, %c0_5] : memref<1x10x80xf32, #tpu.memory_space<vmem>>, vector<1x10x80xf32>
    tpu.vector_store %arg15[%c0_3, %c0_4, %c0_5], %2 {strides = array<i32>} : memref<1x10x80xf32, #tpu.memory_space<vmem>>, vector<1x10x80xf32>,
    %c0_6 = arith.constant 0 : index
    %c0_7 = arith.constant 0 : index
    %c0_8 = arith.constant 0 : index
    %4 = vector.load %arg1[%c0_6, %c0_7, %c0_8] : memref<1x16x64xf32, #tpu.memory_space<vmem>>, vector<1x16x64xf32>
    %5 = vector.shape_cast %4 : vector<1x16x64xf32> to vector<16x64xf32>
    %c0_9 = arith.constant 0 : index
    %c1 = arith.constant 1 : index
    %c4 = arith.constant 4 : index
    %6 = vector.load %arg14[%c0_9, %c1, %c4] : memref<1x18x72xf32, #tpu.memory_space<vmem>>, vector<1x16x64xf32>
    %7 = vector.shape_cast %6 : vector<1x16x64xf32> to vector<16x64xf32>
    %8 = vector.shape_cast %5 : vector<16x64xf32> to vector<1x16x64xf32>
    tpu.vector_store %arg14[%c0_9, %c1, %c4], %8 {strides = array<i32>} : memref<1x18x72xf32, #tpu.memory_space<vmem>>, vector<1x16x64xf32>,
    %cst_10 = arith.constant 0.000000e+00 : f32
    %9 = vector.broadcast %cst_10 : f32 to vector<16x128xf32>
    %c0_11 = arith.constant 0 : index
    %c0_12 = arith.constant 0 : index
    %c0_13 = arith.constant 0 : index
    %10 = vector.load %arg14[%c0_11, %c0_12, %c0_13] : memref<1x18x72xf32, #tpu.memory_space<vmem>>, vector<1x16x64xf32>
    %11 = vector.shape_cast %10 : vector<1x16x64xf32> to vector<16x64xf32>
    %c0_14 = arith.constant 0 : index
    %c0_15 = arith.constant 0 : index
    %c0_16 = arith.constant 0 : index
    %12 = vector.load %arg2[%c0_14, %c0_15, %c0_16] : memref<9x64x128xf32, #tpu.memory_space<vmem>>, vector<1x64x128xf32>
    %13 = vector.shape_cast %12 : vector<1x64x128xf32> to vector<64x128xf32>
    %cst_17 = arith.constant dense<0.000000e+00> : vector<16x128xf32>
    %14 = tpu.matmul %11, %13, %cst_17 {dimension_numbers = #tpu.dot_dimension_numbers<[1], [0], [0], [1], [0, 0, 1, 1], [], []>} : vector<16x64xf32>, vector<64x128xf32>, vector<16x128xf32> -> vector<16x128xf32>
    %15 = arith.addf %9, %14 : vector<16x128xf32>
    %c0_18 = arith.constant 0 : index
    %c0_19 = arith.constant 0 : index
    %c4_20 = arith.constant 4 : index
    %16 = vector.load %arg14[%c0_18, %c0_19, %c4_20] : memref<1x18x72xf32, #tpu.memory_space<vmem>>, vector<1x16x64xf32>
    %17 = vector.shape_cast %16 : vector<1x16x64xf32> to vector<16x64xf32>
    %c1_21 = arith.constant 1 : index
    %c0_22 = arith.constant 0 : index
    %c0_23 = arith.constant 0 : index
    %18 = vector.load %arg2[%c1_21, %c0_22, %c0_23] : memref<9x64x128xf32, #tpu.memory_space<vmem>>, vector<1x64x128xf32>
    %19 = vector.shape_cast %18 : vector<1x64x128xf32> to vector<64x128xf32>
    %cst_24 = arith.constant dense<0.000000e+00> : vector<16x128xf32>
    %20 = tpu.matmul %17, %19, %cst_24 {dimension_numbers = #tpu.dot_dimension_numbers<[1], [0], [0], [1], [0, 0, 1, 1], [], []>} : vector<16x64xf32>, vector<64x128xf32>, vector<16x128xf32> -> vector<16x128xf32>
    %21 = arith.addf %15, %20 : vector<16x128xf32>
    %c0_25 = arith.constant 0 : index
    %c0_26 = arith.constant 0 : index
    %c8 = arith.constant 8 : index
    %22 = vector.load %arg14[%c0_25, %c0_26, %c8] : memref<1x18x72xf32, #tpu.memory_space<vmem>>, vector<1x16x64xf32>
    %23 = vector.shape_cast %22 : vector<1x16x64xf32> to vector<16x64xf32>
    %c2 = arith.constant 2 : index
    %c0_27 = arith.constant 0 : index
    %c0_28 = arith.constant 0 : index
    %24 = vector.load %arg2[%c2, %c0_27, %c0_28] : memref<9x64x128xf32, #tpu.memory_space<vmem>>, vector<1x64x128xf32>
    %25 = vector.shape_cast %24 : vector<1x64x128xf32> to vector<64x128xf32>
    %cst_29 = arith.constant dense<0.000000e+00> : vector<16x128xf32>
    %26 = tpu.matmul %23, %25, %cst_29 {dimension_numbers = #tpu.dot_dimension_numbers<[1], [0], [0], [1], [0, 0, 1, 1], [], []>} : vector<16x64xf32>, vector<64x128xf32>, vector<16x128xf32> -> vector<16x128xf32>
    %27 = arith.addf %21, %26 : vector<16x128xf32>
    %c0_30 = arith.constant 0 : index
    %c1_31 = arith.constant 1 : index
    %c0_32 = arith.constant 0 : index
    %28 = vector.load %arg14[%c0_30, %c1_31, %c0_32] : memref<1x18x72xf32, #tpu.memory_space<vmem>>, vector<1x16x64xf32>
    %29 = vector.shape_cast %28 : vector<1x16x64xf32> to vector<16x64xf32>
    %c3 = arith.constant 3 : index
    %c0_33 = arith.constant 0 : index
    %c0_34 = arith.constant 0 : index
    %30 = vector.load %arg2[%c3, %c0_33, %c0_34] : memref<9x64x128xf32, #tpu.memory_space<vmem>>, vector<1x64x128xf32>
    %31 = vector.shape_cast %30 : vector<1x64x128xf32> to vector<64x128xf32>
    %cst_35 = arith.constant dense<0.000000e+00> : vector<16x128xf32>
    %32 = tpu.matmul %29, %31, %cst_35 {dimension_numbers = #tpu.dot_dimension_numbers<[1], [0], [0], [1], [0, 0, 1, 1], [], []>} : vector<16x64xf32>, vector<64x128xf32>, vector<16x128xf32> -> vector<16x128xf32>
    %33 = arith.addf %27, %32 : vector<16x128xf32>
    %c0_36 = arith.constant 0 : index
    %c1_37 = arith.constant 1 : index
    %c4_38 = arith.constant 4 : index
    %34 = vector.load %arg14[%c0_36, %c1_37, %c4_38] : memref<1x18x72xf32, #tpu.memory_space<vmem>>, vector<1x16x64xf32>
    %35 = vector.shape_cast %34 : vector<1x16x64xf32> to vector<16x64xf32>
    %c4_39 = arith.constant 4 : index
    %c0_40 = arith.constant 0 : index
    %c0_41 = arith.constant 0 : index
    %36 = vector.load %arg2[%c4_39, %c0_40, %c0_41] : memref<9x64x128xf32, #tpu.memory_space<vmem>>, vector<1x64x128xf32>
    %37 = vector.shape_cast %36 : vector<1x64x128xf32> to vector<64x128xf32>
    %cst_42 = arith.constant dense<0.000000e+00> : vector<16x128xf32>
    %38 = tpu.matmul %35, %37, %cst_42 {dimension_numbers = #tpu.dot_dimension_numbers<[1], [0], [0], [1], [0, 0, 1, 1], [], []>} : vector<16x64xf32>, vector<64x128xf32>, vector<16x128xf32> -> vector<16x128xf32>
    %39 = arith.addf %33, %38 : vector<16x128xf32>
    %c0_43 = arith.constant 0 : index
    %c1_44 = arith.constant 1 : index
    %c8_45 = arith.constant 8 : index
    %40 = vector.load %arg14[%c0_43, %c1_44, %c8_45] : memref<1x18x72xf32, #tpu.memory_space<vmem>>, vector<1x16x64xf32>
    %41 = vector.shape_cast %40 : vector<1x16x64xf32> to vector<16x64xf32>
    %c5 = arith.constant 5 : index
    %c0_46 = arith.constant 0 : index
    %c0_47 = arith.constant 0 : index
    %42 = vector.load %arg2[%c5, %c0_46, %c0_47] : memref<9x64x128xf32, #tpu.memory_space<vmem>>, vector<1x64x128xf32>
    %43 = vector.shape_cast %42 : vector<1x64x128xf32> to vector<64x128xf32>
    %cst_48 = arith.constant dense<0.000000e+00> : vector<16x128xf32>
    %44 = tpu.matmul %41, %43, %cst_48 {dimension_numbers = #tpu.dot_dimension_numbers<[1], [0], [0], [1], [0, 0, 1, 1], [], []>} : vector<16x64xf32>, vector<64x128xf32>, vector<16x128xf32> -> vector<16x128xf32>
    %45 = arith.addf %39, %44 : vector<16x128xf32>
    %c0_49 = arith.constant 0 : index
    %c2_50 = arith.constant 2 : index
    %c0_51 = arith.constant 0 : index
    %46 = vector.load %arg14[%c0_49, %c2_50, %c0_51] : memref<1x18x72xf32, #tpu.memory_space<vmem>>, vector<1x16x64xf32>
    %47 = vector.shape_cast %46 : vector<1x16x64xf32> to vector<16x64xf32>
    %c6 = arith.constant 6 : index
    %c0_52 = arith.constant 0 : index
    %c0_53 = arith.constant 0 : index
    %48 = vector.load %arg2[%c6, %c0_52, %c0_53] : memref<9x64x128xf32, #tpu.memory_space<vmem>>, vector<1x64x128xf32>
    %49 = vector.shape_cast %48 : vector<1x64x128xf32> to vector<64x128xf32>
    %cst_54 = arith.constant dense<0.000000e+00> : vector<16x128xf32>
    %50 = tpu.matmul %47, %49, %cst_54 {dimension_numbers = #tpu.dot_dimension_numbers<[1], [0], [0], [1], [0, 0, 1, 1], [], []>} : vector<16x64xf32>, vector<64x128xf32>, vector<16x128xf32> -> vector<16x128xf32>
    %51 = arith.addf %45, %50 : vector<16x128xf32>
    %c0_55 = arith.constant 0 : index
    %c2_56 = arith.constant 2 : index
    %c4_57 = arith.constant 4 : index
    %52 = vector.load %arg14[%c0_55, %c2_56, %c4_57] : memref<1x18x72xf32, #tpu.memory_space<vmem>>, vector<1x16x64xf32>
    %53 = vector.shape_cast %52 : vector<1x16x64xf32> to vector<16x64xf32>
    %c7 = arith.constant 7 : index
    %c0_58 = arith.constant 0 : index
    %c0_59 = arith.constant 0 : index
    %54 = vector.load %arg2[%c7, %c0_58, %c0_59] : memref<9x64x128xf32, #tpu.memory_space<vmem>>, vector<1x64x128xf32>
    %55 = vector.shape_cast %54 : vector<1x64x128xf32> to vector<64x128xf32>
    %cst_60 = arith.constant dense<0.000000e+00> : vector<16x128xf32>
    %56 = tpu.matmul %53, %55, %cst_60 {dimension_numbers = #tpu.dot_dimension_numbers<[1], [0], [0], [1], [0, 0, 1, 1], [], []>} : vector<16x64xf32>, vector<64x128xf32>, vector<16x128xf32> -> vector<16x128xf32>
    %57 = arith.addf %51, %56 : vector<16x128xf32>
    %c0_61 = arith.constant 0 : index
    %c2_62 = arith.constant 2 : index
    %c8_63 = arith.constant 8 : index
    %58 = vector.load %arg14[%c0_61, %c2_62, %c8_63] : memref<1x18x72xf32, #tpu.memory_space<vmem>>, vector<1x16x64xf32>
    %59 = vector.shape_cast %58 : vector<1x16x64xf32> to vector<16x64xf32>
    %c8_64 = arith.constant 8 : index
    %c0_65 = arith.constant 0 : index
    %c0_66 = arith.constant 0 : index
    %60 = vector.load %arg2[%c8_64, %c0_65, %c0_66] : memref<9x64x128xf32, #tpu.memory_space<vmem>>, vector<1x64x128xf32>
    %61 = vector.shape_cast %60 : vector<1x64x128xf32> to vector<64x128xf32>
    %cst_67 = arith.constant dense<0.000000e+00> : vector<16x128xf32>
    %62 = tpu.matmul %59, %61, %cst_67 {dimension_numbers = #tpu.dot_dimension_numbers<[1], [0], [0], [1], [0, 0, 1, 1], [], []>} : vector<16x64xf32>, vector<64x128xf32>, vector<16x128xf32> -> vector<16x128xf32>
    %63 = arith.addf %57, %62 : vector<16x128xf32>
    %c0_68 = arith.constant 0 : index
    %c0_69 = arith.constant 0 : index
    %64 = vector.load %arg3[%c0_68, %c0_69] : memref<1x128xf32, #tpu.memory_space<vmem>>, vector<1x128xf32>
    %65 = vector.broadcast %64 : vector<1x128xf32> to vector<16x128xf32>
    %66 = arith.addf %63, %65 : vector<16x128xf32>
    %cst_70 = arith.constant 0.000000e+00 : f32
    %67 = vector.broadcast %cst_70 : f32 to vector<16x128xf32>
    %68 = arith.maximumf %66, %67 : vector<16x128xf32>
    %c0_71 = arith.constant 0 : index
    %c0_72 = arith.constant 0 : index
    %69 = vector.load %arg4[%c0_71, %c0_72] : memref<8x16xf32, #tpu.memory_space<vmem>>, vector<8x16xf32>
    %cst_73 = arith.constant dense<0.000000e+00> : vector<8x128xf32>
    %70 = tpu.matmul %69, %68, %cst_73 {dimension_numbers = #tpu.dot_dimension_numbers<[1], [0], [0], [1], [0, 0, 1, 1], [], []>} : vector<8x16xf32>, vector<16x128xf32>, vector<8x128xf32> -> vector<8x128xf32>
    %c0_74 = arith.constant 0 : index
    %c0_75 = arith.constant 0 : index
    %71 = vector.load %arg5[%c0_74, %c0_75] : memref<8x16xf32, #tpu.memory_space<vmem>>, vector<8x16xf32>
    %cst_76 = arith.constant dense<0.000000e+00> : vector<8x128xf32>
    %72 = tpu.matmul %71, %68, %cst_76 {dimension_numbers = #tpu.dot_dimension_numbers<[1], [0], [0], [1], [0, 0, 1, 1], [], []>} : vector<8x16xf32>, vector<16x128xf32>, vector<8x128xf32> -> vector<8x128xf32>
    %73 = arith.maximumf %70, %72 : vector<8x128xf32>
    %c0_77 = arith.constant 0 : index
    %c0_78 = arith.constant 0 : index
    %74 = vector.load %arg6[%c0_77, %c0_78] : memref<128x64xf32, #tpu.memory_space<vmem>>, vector<128x64xf32>
    %cst_79 = arith.constant dense<0.000000e+00> : vector<8x64xf32>
    %75 = tpu.matmul %73, %74, %cst_79 {dimension_numbers = #tpu.dot_dimension_numbers<[1], [0], [0], [1], [0, 0, 1, 1], [], []>} : vector<8x128xf32>, vector<128x64xf32>, vector<8x64xf32> -> vector<8x64xf32>
    %c0_80 = arith.constant 0 : index
    %c0_81 = arith.constant 0 : index
    %76 = vector.load %arg7[%c0_80, %c0_81] : memref<128x64xf32, #tpu.memory_space<vmem>>, vector<128x64xf32>
    %cst_82 = arith.constant dense<0.000000e+00> : vector<8x64xf32>
    %77 = tpu.matmul %73, %76, %cst_82 {dimension_numbers = #tpu.dot_dimension_numbers<[1], [0], [0], [1], [0, 0, 1, 1], [], []>} : vector<8x128xf32>, vector<128x64xf32>, vector<8x64xf32> -> vector<8x64xf32>
    %78 = arith.maximumf %75, %77 : vector<8x64xf32>
    %c0_83 = arith.constant 0 : index
    %c1_84 = arith.constant 1 : index
    %c8_85 = arith.constant 8 : index
    %79 = vector.load %arg15[%c0_83, %c1_84, %c8_85] : memref<1x10x80xf32, #tpu.memory_space<vmem>>, vector<1x8x64xf32>
    %80 = vector.shape_cast %79 : vector<1x8x64xf32> to vector<8x64xf32>
    %81 = vector.shape_cast %78 : vector<8x64xf32> to vector<1x8x64xf32>
    tpu.vector_store %arg15[%c0_83, %c1_84, %c8_85], %81 {strides = array<i32>} : memref<1x10x80xf32, #tpu.memory_space<vmem>>, vector<1x8x64xf32>,
    %cst_86 = arith.constant 0.000000e+00 : f32
    %82 = vector.broadcast %cst_86 : f32 to vector<8x128xf32>
    %c0_87 = arith.constant 0 : index
    %c0_88 = arith.constant 0 : index
    %c0_89 = arith.constant 0 : index
    %83 = vector.load %arg15[%c0_87, %c0_88, %c0_89] : memref<1x10x80xf32, #tpu.memory_space<vmem>>, vector<1x8x64xf32>
    %84 = vector.shape_cast %83 : vector<1x8x64xf32> to vector<8x64xf32>
    %c0_90 = arith.constant 0 : index
    %c0_91 = arith.constant 0 : index
    %c0_92 = arith.constant 0 : index
    %85 = vector.load %arg8[%c0_90, %c0_91, %c0_92] : memref<9x64x128xf32, #tpu.memory_space<vmem>>, vector<1x64x128xf32>
    %86 = vector.shape_cast %85 : vector<1x64x128xf32> to vector<64x128xf32>
    %cst_93 = arith.constant dense<0.000000e+00> : vector<8x128xf32>
    %87 = tpu.matmul %84, %86, %cst_93 {dimension_numbers = #tpu.dot_dimension_numbers<[1], [0], [0], [1], [0, 0, 1, 1], [], []>} : vector<8x64xf32>, vector<64x128xf32>, vector<8x128xf32> -> vector<8x128xf32>
    %88 = arith.addf %82, %87 : vector<8x128xf32>
    %c0_94 = arith.constant 0 : index
    %c0_95 = arith.constant 0 : index
    %c8_96 = arith.constant 8 : index
    %89 = vector.load %arg15[%c0_94, %c0_95, %c8_96] : memref<1x10x80xf32, #tpu.memory_space<vmem>>, vector<1x8x64xf32>
    %90 = vector.shape_cast %89 : vector<1x8x64xf32> to vector<8x64xf32>
    %c1_97 = arith.constant 1 : index
    %c0_98 = arith.constant 0 : index
    %c0_99 = arith.constant 0 : index
    %91 = vector.load %arg8[%c1_97, %c0_98, %c0_99] : memref<9x64x128xf32, #tpu.memory_space<vmem>>, vector<1x64x128xf32>
    %92 = vector.shape_cast %91 : vector<1x64x128xf32> to vector<64x128xf32>
    %cst_100 = arith.constant dense<0.000000e+00> : vector<8x128xf32>
    %93 = tpu.matmul %90, %92, %cst_100 {dimension_numbers = #tpu.dot_dimension_numbers<[1], [0], [0], [1], [0, 0, 1, 1], [], []>} : vector<8x64xf32>, vector<64x128xf32>, vector<8x128xf32> -> vector<8x128xf32>
    %94 = arith.addf %88, %93 : vector<8x128xf32>
    %c0_101 = arith.constant 0 : index
    %c0_102 = arith.constant 0 : index
    %c16 = arith.constant 16 : index
    %95 = vector.load %arg15[%c0_101, %c0_102, %c16] : memref<1x10x80xf32, #tpu.memory_space<vmem>>, vector<1x8x64xf32>
    %96 = vector.shape_cast %95 : vector<1x8x64xf32> to vector<8x64xf32>
    %c2_103 = arith.constant 2 : index
    %c0_104 = arith.constant 0 : index
    %c0_105 = arith.constant 0 : index
    %97 = vector.load %arg8[%c2_103, %c0_104, %c0_105] : memref<9x64x128xf32, #tpu.memory_space<vmem>>, vector<1x64x128xf32>
    %98 = vector.shape_cast %97 : vector<1x64x128xf32> to vector<64x128xf32>
    %cst_106 = arith.constant dense<0.000000e+00> : vector<8x128xf32>
    %99 = tpu.matmul %96, %98, %cst_106 {dimension_numbers = #tpu.dot_dimension_numbers<[1], [0], [0], [1], [0, 0, 1, 1], [], []>} : vector<8x64xf32>, vector<64x128xf32>, vector<8x128xf32> -> vector<8x128xf32>
    %100 = arith.addf %94, %99 : vector<8x128xf32>
    %c0_107 = arith.constant 0 : index
    %c1_108 = arith.constant 1 : index
    %c0_109 = arith.constant 0 : index
    %101 = vector.load %arg15[%c0_107, %c1_108, %c0_109] : memref<1x10x80xf32, #tpu.memory_space<vmem>>, vector<1x8x64xf32>
    %102 = vector.shape_cast %101 : vector<1x8x64xf32> to vector<8x64xf32>
    %c3_110 = arith.constant 3 : index
    %c0_111 = arith.constant 0 : index
    %c0_112 = arith.constant 0 : index
    %103 = vector.load %arg8[%c3_110, %c0_111, %c0_112] : memref<9x64x128xf32, #tpu.memory_space<vmem>>, vector<1x64x128xf32>
    %104 = vector.shape_cast %103 : vector<1x64x128xf32> to vector<64x128xf32>
    %cst_113 = arith.constant dense<0.000000e+00> : vector<8x128xf32>
    %105 = tpu.matmul %102, %104, %cst_113 {dimension_numbers = #tpu.dot_dimension_numbers<[1], [0], [0], [1], [0, 0, 1, 1], [], []>} : vector<8x64xf32>, vector<64x128xf32>, vector<8x128xf32> -> vector<8x128xf32>
    %106 = arith.addf %100, %105 : vector<8x128xf32>
    %c0_114 = arith.constant 0 : index
    %c1_115 = arith.constant 1 : index
    %c8_116 = arith.constant 8 : index
    %107 = vector.load %arg15[%c0_114, %c1_115, %c8_116] : memref<1x10x80xf32, #tpu.memory_space<vmem>>, vector<1x8x64xf32>
    %108 = vector.shape_cast %107 : vector<1x8x64xf32> to vector<8x64xf32>
    %c4_117 = arith.constant 4 : index
    %c0_118 = arith.constant 0 : index
    %c0_119 = arith.constant 0 : index
    %109 = vector.load %arg8[%c4_117, %c0_118, %c0_119] : memref<9x64x128xf32, #tpu.memory_space<vmem>>, vector<1x64x128xf32>
    %110 = vector.shape_cast %109 : vector<1x64x128xf32> to vector<64x128xf32>
    %cst_120 = arith.constant dense<0.000000e+00> : vector<8x128xf32>
    %111 = tpu.matmul %108, %110, %cst_120 {dimension_numbers = #tpu.dot_dimension_numbers<[1], [0], [0], [1], [0, 0, 1, 1], [], []>} : vector<8x64xf32>, vector<64x128xf32>, vector<8x128xf32> -> vector<8x128xf32>
    %112 = arith.addf %106, %111 : vector<8x128xf32>
    %c0_121 = arith.constant 0 : index
    %c1_122 = arith.constant 1 : index
    %c16_123 = arith.constant 16 : index
    %113 = vector.load %arg15[%c0_121, %c1_122, %c16_123] : memref<1x10x80xf32, #tpu.memory_space<vmem>>, vector<1x8x64xf32>
    %114 = vector.shape_cast %113 : vector<1x8x64xf32> to vector<8x64xf32>
    %c5_124 = arith.constant 5 : index
    %c0_125 = arith.constant 0 : index
    %c0_126 = arith.constant 0 : index
    %115 = vector.load %arg8[%c5_124, %c0_125, %c0_126] : memref<9x64x128xf32, #tpu.memory_space<vmem>>, vector<1x64x128xf32>
    %116 = vector.shape_cast %115 : vector<1x64x128xf32> to vector<64x128xf32>
    %cst_127 = arith.constant dense<0.000000e+00> : vector<8x128xf32>
    %117 = tpu.matmul %114, %116, %cst_127 {dimension_numbers = #tpu.dot_dimension_numbers<[1], [0], [0], [1], [0, 0, 1, 1], [], []>} : vector<8x64xf32>, vector<64x128xf32>, vector<8x128xf32> -> vector<8x128xf32>
    %118 = arith.addf %112, %117 : vector<8x128xf32>
    %c0_128 = arith.constant 0 : index
    %c2_129 = arith.constant 2 : index
    %c0_130 = arith.constant 0 : index
    %119 = vector.load %arg15[%c0_128, %c2_129, %c0_130] : memref<1x10x80xf32, #tpu.memory_space<vmem>>, vector<1x8x64xf32>
    %120 = vector.shape_cast %119 : vector<1x8x64xf32> to vector<8x64xf32>
    %c6_131 = arith.constant 6 : index
    %c0_132 = arith.constant 0 : index
    %c0_133 = arith.constant 0 : index
    %121 = vector.load %arg8[%c6_131, %c0_132, %c0_133] : memref<9x64x128xf32, #tpu.memory_space<vmem>>, vector<1x64x128xf32>
    %122 = vector.shape_cast %121 : vector<1x64x128xf32> to vector<64x128xf32>
    %cst_134 = arith.constant dense<0.000000e+00> : vector<8x128xf32>
    %123 = tpu.matmul %120, %122, %cst_134 {dimension_numbers = #tpu.dot_dimension_numbers<[1], [0], [0], [1], [0, 0, 1, 1], [], []>} : vector<8x64xf32>, vector<64x128xf32>, vector<8x128xf32> -> vector<8x128xf32>
    %124 = arith.addf %118, %123 : vector<8x128xf32>
    %c0_135 = arith.constant 0 : index
    %c2_136 = arith.constant 2 : index
    %c8_137 = arith.constant 8 : index
    %125 = vector.load %arg15[%c0_135, %c2_136, %c8_137] : memref<1x10x80xf32, #tpu.memory_space<vmem>>, vector<1x8x64xf32>
    %126 = vector.shape_cast %125 : vector<1x8x64xf32> to vector<8x64xf32>
    %c7_138 = arith.constant 7 : index
    %c0_139 = arith.constant 0 : index
    %c0_140 = arith.constant 0 : index
    %127 = vector.load %arg8[%c7_138, %c0_139, %c0_140] : memref<9x64x128xf32, #tpu.memory_space<vmem>>, vector<1x64x128xf32>
    %128 = vector.shape_cast %127 : vector<1x64x128xf32> to vector<64x128xf32>
    %cst_141 = arith.constant dense<0.000000e+00> : vector<8x128xf32>
    %129 = tpu.matmul %126, %128, %cst_141 {dimension_numbers = #tpu.dot_dimension_numbers<[1], [0], [0], [1], [0, 0, 1, 1], [], []>} : vector<8x64xf32>, vector<64x128xf32>, vector<8x128xf32> -> vector<8x128xf32>
    %130 = arith.addf %124, %129 : vector<8x128xf32>
    %c0_142 = arith.constant 0 : index
    %c2_143 = arith.constant 2 : index
    %c16_144 = arith.constant 16 : index
    %131 = vector.load %arg15[%c0_142, %c2_143, %c16_144] : memref<1x10x80xf32, #tpu.memory_space<vmem>>, vector<1x8x64xf32>
    %132 = vector.shape_cast %131 : vector<1x8x64xf32> to vector<8x64xf32>
    %c8_145 = arith.constant 8 : index
    %c0_146 = arith.constant 0 : index
    %c0_147 = arith.constant 0 : index
    %133 = vector.load %arg8[%c8_145, %c0_146, %c0_147] : memref<9x64x128xf32, #tpu.memory_space<vmem>>, vector<1x64x128xf32>
    %134 = vector.shape_cast %133 : vector<1x64x128xf32> to vector<64x128xf32>
    %cst_148 = arith.constant dense<0.000000e+00> : vector<8x128xf32>
    %135 = tpu.matmul %132, %134, %cst_148 {dimension_numbers = #tpu.dot_dimension_numbers<[1], [0], [0], [1], [0, 0, 1, 1], [], []>} : vector<8x64xf32>, vector<64x128xf32>, vector<8x128xf32> -> vector<8x128xf32>
    %136 = arith.addf %130, %135 : vector<8x128xf32>
    %c0_149 = arith.constant 0 : index
    %c0_150 = arith.constant 0 : index
    %137 = vector.load %arg9[%c0_149, %c0_150] : memref<1x128xf32, #tpu.memory_space<vmem>>, vector<1x128xf32>
    %138 = vector.broadcast %137 : vector<1x128xf32> to vector<8x128xf32>
    %139 = arith.addf %136, %138 : vector<8x128xf32>
    %140 = math.tanh %139 : vector<8x128xf32>
    %c0_151 = arith.constant 0 : index
    %c0_152 = arith.constant 0 : index
    %141 = vector.load %arg10[%c0_151, %c0_152] : memref<4x8xf32, #tpu.memory_space<vmem>>, vector<4x8xf32>
    %cst_153 = arith.constant dense<0.000000e+00> : vector<4x128xf32>
    %142 = tpu.matmul %141, %140, %cst_153 {dimension_numbers = #tpu.dot_dimension_numbers<[1], [0], [0], [1], [0, 0, 1, 1], [], []>} : vector<4x8xf32>, vector<8x128xf32>, vector<4x128xf32> -> vector<4x128xf32>
    %c0_154 = arith.constant 0 : index
    %c0_155 = arith.constant 0 : index
    %143 = vector.load %arg11[%c0_154, %c0_155] : memref<128x512xf32, #tpu.memory_space<vmem>>, vector<128x512xf32>
    %cst_156 = arith.constant dense<0.000000e+00> : vector<4x512xf32>
    %144 = tpu.matmul %142, %143, %cst_156 {dimension_numbers = #tpu.dot_dimension_numbers<[1], [0], [0], [1], [0, 0, 1, 1], [], []>} : vector<4x128xf32>, vector<128x512xf32>, vector<4x512xf32> -> vector<4x512xf32>
    %c0_157 = arith.constant 0 : index
    %c0_158 = arith.constant 0 : index
    %145 = vector.load %arg12[%c0_157, %c0_158] : memref<1x512xf32, #tpu.memory_space<vmem>>, vector<1x512xf32>
    %146 = vector.broadcast %145 : vector<1x512xf32> to vector<4x512xf32>
    %147 = arith.addf %144, %146 : vector<4x512xf32>
    %cst_159 = arith.constant 0.000000e+00 : f32
    %148 = vector.broadcast %cst_159 : f32 to vector<4x512xf32>
    %149 = arith.subf %148, %147 : vector<4x512xf32>
    %150 = math.exp %149 : vector<4x512xf32>
    %cst_160 = arith.constant 1.000000e+00 : f32
    %151 = vector.broadcast %cst_160 : f32 to vector<4x512xf32>
    %152 = arith.addf %151, %150 : vector<4x512xf32>
    %153 = tpu.reciprocal %152 : vector<4x512xf32> -> vector<4x512xf32>
    %c0_161 = arith.constant 0 : index
    %c0_162 = arith.constant 0 : index
    %c0_163 = arith.constant 0 : index
    %154 = vector.load %arg13[%c0_161, %c0_162, %c0_163] : memref<1x4x512xf32, #tpu.memory_space<vmem>>, vector<1x4x512xf32>
    %155 = vector.shape_cast %154 : vector<1x4x512xf32> to vector<4x512xf32>
    %156 = vector.shape_cast %153 : vector<4x512xf32> to vector<1x4x512xf32>
    tpu.vector_store %arg13[%c0_161, %c0_162, %c0_163], %156 {strides = array<i32>} : memref<1x4x512xf32, #tpu.memory_space<vmem>>, vector<1x4x512xf32>,
    return
  }
  func.func @transform_0(%arg0: i32) -> (i32, i32, i32) {
    %c0_i32 = arith.constant 0 : i32
    %c0_i32_0 = arith.constant 0 : i32
    %c0_i32_1 = arith.constant 0 : i32
    return %arg0, %c0_i32, %c0_i32_0 : i32, i32, i32
  }
  func.func @transform_1(%arg0: i32) -> (i32, i32, i32) {
    %c0_i32 = arith.constant 0 : i32
    %c0_i32_0 = arith.constant 0 : i32
    %c0_i32_1 = arith.constant 0 : i32
    %c0_i32_2 = arith.constant 0 : i32
    return %c0_i32, %c0_i32_0, %c0_i32_1 : i32, i32, i32
  }
  func.func @transform_2(%arg0: i32) -> (i32, i32) {
    %c0_i32 = arith.constant 0 : i32
    %c0_i32_0 = arith.constant 0 : i32
    %c0_i32_1 = arith.constant 0 : i32
    return %c0_i32, %c0_i32_0 : i32, i32
  }
  func.func @transform_3(%arg0: i32) -> (i32, i32) {
    %c0_i32 = arith.constant 0 : i32
    %c0_i32_0 = arith.constant 0 : i32
    %c0_i32_1 = arith.constant 0 : i32
    return %c0_i32, %c0_i32_0 : i32, i32
  }
  func.func @transform_4(%arg0: i32) -> (i32, i32) {
    %c0_i32 = arith.constant 0 : i32
    %c0_i32_0 = arith.constant 0 : i32
    %c0_i32_1 = arith.constant 0 : i32
    return %c0_i32, %c0_i32_0 : i32, i32
  }
  func.func @transform_5(%arg0: i32) -> (i32, i32) {
    %c0_i32 = arith.constant 0 : i32
    %c0_i32_0 = arith.constant 0 : i32
    %c0_i32_1 = arith.constant 0 : i32
    return %c0_i32, %c0_i32_0 : i32, i32
  }
  func.func @transform_6(%arg0: i32) -> (i32, i32) {
    %c0_i32 = arith.constant 0 : i32
    %c0_i32_0 = arith.constant 0 : i32
    %c0_i32_1 = arith.constant 0 : i32
    return %c0_i32, %c0_i32_0 : i32, i32
  }
  func.func @transform_7(%arg0: i32) -> (i32, i32, i32) {
    %c0_i32 = arith.constant 0 : i32
    %c0_i32_0 = arith.constant 0 : i32
    %c0_i32_1 = arith.constant 0 : i32
    %c0_i32_2 = arith.constant 0 : i32
    return %c0_i32, %c0_i32_0, %c0_i32_1 : i32, i32, i32
  }
  func.func @transform_8(%arg0: i32) -> (i32, i32) {
    %c0_i32 = arith.constant 0 : i32
    %c0_i32_0 = arith.constant 0 : i32
    %c0_i32_1 = arith.constant 0 : i32
    return %c0_i32, %c0_i32_0 : i32, i32
  }
  func.func @transform_9(%arg0: i32) -> (i32, i32) {
    %c0_i32 = arith.constant 0 : i32
    %c0_i32_0 = arith.constant 0 : i32
    %c0_i32_1 = arith.constant 0 : i32
    return %c0_i32, %c0_i32_0 : i32, i32
  }
  func.func @transform_10(%arg0: i32) -> (i32, i32) {
    %c0_i32 = arith.constant 0 : i32
    %c0_i32_0 = arith.constant 0 : i32
    %c0_i32_1 = arith.constant 0 : i32
    return %c0_i32, %c0_i32_0 : i32, i32
  }
  func.func @transform_11(%arg0: i32) -> (i32, i32) {
    %c0_i32 = arith.constant 0 : i32
    %c0_i32_0 = arith.constant 0 : i32
    %c0_i32_1 = arith.constant 0 : i32
    return %c0_i32, %c0_i32_0 : i32, i32
  }
  func.func @transform_12(%arg0: i32) -> (i32, i32, i32) {
    %c0_i32 = arith.constant 0 : i32
    %c0_i32_0 = arith.constant 0 : i32
    %c0_i32_1 = arith.constant 0 : i32
    return %arg0, %c0_i32, %c0_i32_0 : i32, i32, i32
  }
}

</mosaic_0001>

<bundles_post_ra>
// kernel: nn_model_forward.1
= control target key start
LH: loop header
LB: loop body
LE: loop exit
PB: predicated region body
PF: predicated region fallthrough
CT: control target
= control target key end

     0   :  { %17 = vsyncpa [#allocation5], 0  ;;  %s2225_s0 = inlined_call_operand.vmem [shape: f32[2,16,64], index: 0, kind: input, shape index: {}]   ;;  %s2226_s1 = inlined_call_operand.hbm [shape: f32[9,64,128], index: 1, kind: input, shape index: {}]   ;;  %s2227_s2 = inlined_call_operand.vmem [shape: f32[1,128], index: 2, kind: input, shape index: {}]   ;;  %s2228_s3 = inlined_call_operand.vmem [shape: f32[8,16], index: 3, kind: input, shape index: {}]   ;;  %s2229_s4 = inlined_call_operand.vmem [shape: f32[8,16], index: 4, kind: input, shape index: {}]   ;;  %s2230_s5 = inlined_call_operand.vmem [shape: f32[128,64], index: 5, kind: input, shape index: {}]   ;;  %s2231_s6 = inlined_call_operand.vmem [shape: f32[128,64], index: 6, kind: input, shape index: {}]   ;;  %s2232_s7 = inlined_call_operand.hbm [shape: f32[9,64,128], index: 7, kind: input, shape index: {}]   ;;  %s2233_s8 = inlined_call_operand.vmem [shape: f32[1,128], index: 8, kind: input, shape index: {}]   ;;  %s2234_s9 = inlined_call_operand.vmem [shape: f32[4,8], index: 9, kind: input, shape index: {}]   ;;  %s2235_s10 = inlined_call_operand.hbm [shape: f32[128,512], index: 10, kind: input, shape index: {}]   ;;  %s2236_s11 = inlined_call_operand.vmem [shape: f32[1,512], index: 11, kind: input, shape index: {}]   ;;  %s2237_s12 = inlined_call_operand.vmem [shape: f32[2,4,512], index: 12, kind: output, shape index: {}]  }
   0x1   :  { %18 = vsyncpa [#allocation7], 0  ;;  %s1958_s21 = smov 0  }
   0x2 LB: > { %s1964_s22 = sadd.s32 4294967295, %s1878_s21   ;;  %p1658_p0 = scmp.ge.s32.totalorder %s1878_s21, 1  ;;  %s1878_s21 = sphi %s1958_s21, %s24_s21  }
   0x3   : > { %p312_p1 = scmp.lt.s32.totalorder %s1878_s21, 3  ;;  %p1727_p2 = scmp.eq.s32.totalorder %s1964_s22, 0 }
   0x4   : > { %s352_s25 = sshll.u32 %s2232_s7, 4  ;;  %s323_s29 = sshll.u32 %s2226_s1, 4  ;;  %s353_s25 = int_to_ptr.hbm [resolvable:$true] %s352_s25  ;;  %s324_s29 = int_to_ptr.hbm [resolvable:$true] %s323_s29 }
   0x5   : > { %p1972_p3 = pnand %p1658_p0, %p312_p1  ;;  %s1880_s30 = smov [#allocation6]  }
   0x6   : > { %s354_s13 = sshll.u32 %s1880_s30, 4  ;;  %s1881_s15 = smov [#allocation4]   ;;  %s355_s13 = int_to_ptr.vmem [resolvable:$true] %s354_s13 }
   0x7   : > { %p1717_p4 = pneg %p1972_p3  ;;  %s325_s16 = sshll.u32 %s1881_s15, 4  ;;  %s326_s16 = int_to_ptr.vmem [resolvable:$true] %s325_s16 }
   0x8   : > { %s372_s19 = sshll.u32 %s2235_s10, 4  ;;  %s1882_s20 = smov 128   ;;  %s373_s19 = int_to_ptr.hbm [resolvable:$true] %s372_s19 }
   0x9   : > { %p1983_p5 = pnand %p1727_p2, %p1717_p4  ;;  %s1883_s23 = smov 8  }
   0xa   : > { %s1884_s24 = smov [#allocation8]   ;;  %s1885_s28 = smov 512  }
   0xb   : > { %1723 = dma.hbm_to_vmem [thread:$0]  (!%p1983_p5), %s353_s25, 9216, %s355_s13, [#allocation7], %s1882_s20, %s1882_s20, %s1883_s23  }
   0xc   : > { %1720 = dma.hbm_to_vmem [thread:$0]  (!%p1983_p5), %s324_s29, 9216, %s326_s16, [#allocation5], %s1882_s20, %s1882_s20, %s1883_s23  }
   0xd   : > { %s374_s27 = sshll.u32 %s1884_s24, 4  ;;  %s1886_s30 = smov 32   ;;  %s375_s27 = int_to_ptr.vmem [resolvable:$true] %s374_s27 }
   0xe   : > { %1726 = dma.hbm_to_vmem [thread:$0]  (!%p1983_p5), %s373_s19, 8192, %s375_s27, [#allocation7], %s1885_s28, %s1885_s28, %s1886_s30  }
   0xf   : > { %401 = sbr.rel (%p1972_p3) target bundleno = 1380 (0x564), region = 68 }
  0x14   : > { %1869 = dma.done.wait (%p1727_p2), [#allocation5], 9216  }
  0x15   : > { %1871 = vsyncadd (%p1727_p2), [#allocation5], 4294958080 }
  0x16   : > { %1873 = dma.done.wait (%p1727_p2), [#allocation7], 17408  }
  0x17   : > { %1875 = vsyncadd (%p1727_p2), [#allocation7], 4294949888  ;;  %p454_p6 = scmp.lt.s32.totalorder %s1964_s22, 1  ;;  %vm464_vm0 = vcmask 588800   ;;  %v1887_v0 = vmov 0.0   ;;  %v495_v2 = vld [vmem:[#allocation4 + $0x38] sm:$0xff] }
  0x18   : > { %465 = vst.msk [vmem:[#allocation2] sm:$0xff] %vm464_vm0, %v1887_v0  ;;  %s1888_s14 = smov 4   ;;  %551 = vmatpush.msra.mxu1 %v495_v2  ;;  %v618_v3 = vld [vmem:[#allocation4 + $0xf8] sm:$0xff]  ;;  %v494_v4 = vld [vmem:[#allocation4 + $0x30] sm:$0xff]  ;;  %v493_v6 = vld [vmem:[#allocation4 + $0x28] sm:$0xff]  ;;  %vm467_vm1 = vcmask 582656  }
  0x19   : > { %s2245_s22 = smov (!%p454_p6, %s1964_s22), 1  ;;  %466 = vst.msk [vmem:[#allocation2 + $0x8] sm:$0xff] %vm464_vm0, %v1887_v0  ;;  %v617_v5 = vld [vmem:[#allocation4 + $0xf0] sm:$0xff]  ;;  %633 = vmatpush.msra.mxu3 %v618_v3  ;;  %v616_v7 = vld [vmem:[#allocation4 + $0xe8] sm:$0xff]  ;;  %v492_v8 = vld [vmem:[#allocation4 + $0x20] sm:$0xff]  ;;  %vm483_vm2 = vcmask 556064  }
  0x1a   : > { %s1703_s25 = sshll.u32 %s2245_s22, 4  ;;  %552 = vmatpush.msra.mxu1 %v494_v4  ;;  %v615_v9 = vld [vmem:[#allocation4 + $0xe0] sm:$0xff]  ;;  %v491_v11 = vld [vmem:[#allocation4 + $0x18] sm:$0xff]  ;;  %v490_v13 = vld [vmem:[#allocation4 + $0x10] sm:$0xff]  ;;  %468 = vst.msk [vmem:[#allocation2 + $0x10] sm:$0x3] %vm467_vm1, %v1887_v0 }
  0x1b   : > { %s458_s13 = scalar_lea.vmem %s2225_s0, %s1703_s25  ;;  %634 = vmatpush.msra.mxu3 %v617_v5  ;;  %v614_v12 = vld [vmem:[#allocation4 + $0xd8] sm:$0xff]  ;;  %v613_v14 = vld [vmem:[#allocation4 + $0xd0] sm:$0xff]  ;;  %v489_v15 = vld [vmem:[#allocation4 + $0x8] sm:$0xff]  ;;  %vm511_vm3 = vcmask 523264   ;;  %s1889_s15 = smov 124   ;;  %vm869_vm4 = vcmask 130048  }
  0x1c   : > { %v473_v1 = vld [vmem:[%s458_s13] sm:$0xff]  ;;  %553 = vmatpush.msra.mxu1 %v493_v6  ;;  %v474_v10 = vld [vmem:[%s458_s13 + $0x8] sm:$0xff]  ;;  %v612_v16 = vld [vmem:[#allocation4 + $0xc8] sm:$0xff]  ;;  %s1890_s16 = smov 120   ;;  %vm469_vm5 = vcmask 654336   ;;  %vm471_vm6 = vcmask 648192   ;;  %s463_s26 = scalar_lea.vmem %s2237_s12, %s1703_s25 }
  0x1d   : > { %477 = vrot.lane.b32.xlu0 %v473_v1, %s1888_s14  ;;  %635 = vmatpush.msra.mxu3 %v616_v7  ;;  %v488_v17 = vld [vmem:[#allocation4] sm:$0xff]  ;;  %v504_v27 = vld [vmem:[#allocation4 + $0x78] sm:$0xff]  ;;  %v503_v29 = vld [vmem:[#allocation4 + $0x70] sm:$0xff]  ;;  %470 = vst.msk [vmem:[#allocation3] sm:$0xff] %vm469_vm5, %v1887_v0  ;;  %s1891_s17 = smov 8   ;;  %vm995_vm7 = vcmask 588864  }
  0x1e   : > { %554 = vmatpush.msra.mxu1 %v492_v8  ;;  %v611_v18 = vld [vmem:[#allocation4 + $0xc0] sm:$0xff]  ;;  %v784_v28 = vld [vmem:[#allocation4 + $0x1f8] sm:$0xff]  ;;  %524 = vmatpush.msra.mxu0 %v504_v27  ;;  %v783_v30 = vld [vmem:[#allocation4 + $0x1f0] sm:$0xff]  ;;  %472 = vst.msk [vmem:[#allocation3 + $0x8] sm:$0x3] %vm471_vm6, %v1887_v0  ;;  %s1892_s18 = smov 112  }
  0x1f   : > { %636 = vmatpush.msra.mxu3 %v615_v9  ;;  %v502_v31 = vld [vmem:[#allocation4 + $0x68] sm:$0xff]  ;;  %v501_v33 = vld [vmem:[#allocation4 + $0x60] sm:$0xff]  ;;  %v500_v35 = vld [vmem:[#allocation4 + $0x58] sm:$0xff]  ;;  %vm1307_vm8 = vcmask 64512   ;;  %vm1563_vm11 = vcmask 1043456  }
  0x20   : > { %555 = vmatpush.msra.mxu1 %v491_v11  ;;  %v782_v32 = vld [vmem:[#allocation4 + $0x1e8] sm:$0xff]  ;;  %525 = vmatpush.msra.mxu0 %v503_v29  ;;  %v781_v34 = vld [vmem:[#allocation4 + $0x1e0] sm:$0xff]  ;;  %v574_v36 = vld [vmem:[#allocation4 + $0xb8] sm:$0xff] }
  0x21   : > { %637 = vmatpush.msra.mxu3 %v614_v12  ;;  %v700_v37 = vld [vmem:[#allocation4 + $0x178] sm:$0xff]  ;;  %591 = vmatpush.msra.mxu2 %v574_v36  ;;  %v499_v39 = vld [vmem:[#allocation4 + $0x50] sm:$0xff]  ;;  %v498_v43 = vld [vmem:[#allocation4 + $0x48] sm:$0xff] }
  0x22   : > { %556 = vmatpush.msra.mxu1 %v490_v13  ;;  %526 = vmatpush.msra.mxu0 %v502_v31  ;;  %v780_v38 = vld [vmem:[#allocation4 + $0x1d8] sm:$0xff]  ;;  %v573_v40 = vld [vmem:[#allocation4 + $0xb0] sm:$0xff]  ;;  %v572_v44 = vld [vmem:[#allocation4 + $0xa8] sm:$0xff] }
  0x23   : > { %638 = vmatpush.msra.mxu3 %v613_v14  ;;  %v699_v41 = vld [vmem:[#allocation4 + $0x170] sm:$0xff]  ;;  %592 = vmatpush.msra.mxu2 %v573_v40  ;;  %v698_v45 = vld [vmem:[#allocation4 + $0x168] sm:$0xff]  ;;  %v497_v47 = vld [vmem:[#allocation4 + $0x40] sm:$0xff] }
  0x24   : > { %557 = vmatpush.msra.mxu1 %v489_v15  ;;  %527 = vmatpush.msra.mxu0 %v501_v33  ;;  %v779_v42 = vld [vmem:[#allocation4 + $0x1d0] sm:$0xff]  ;;  %v778_v46 = vld [vmem:[#allocation4 + $0x1c8] sm:$0xff]  ;;  %v571_v48 = vld [vmem:[#allocation4 + $0xa0] sm:$0xff] }
  0x25   : > { %479 = vrot.lane.b32.xlu0 %v474_v10, %s1888_s14  ;;  %639 = vmatpush.msra.mxu3 %v612_v16  ;;  %v697_v49 = vld [vmem:[#allocation4 + $0x160] sm:$0xff]  ;;  %v570_v51 = vld [vmem:[#allocation4 + $0x98] sm:$0xff]  ;;  %v569_v54 = vld [vmem:[#allocation4 + $0x90] sm:$0xff] }
  0x26   : > { %558 = vmatpush.msra.mxu1 %v488_v17  ;;  %528 = vmatpush.msra.mxu0 %v500_v35  ;;  %v777_v50 = vld [vmem:[#allocation4 + $0x1c0] sm:$0xff]  ;;  %v658_v52 = vld [vmem:[#allocation4 + $0x138] sm:$0xff]  ;;  %v657_v55 = vld [vmem:[#allocation4 + $0x130] sm:$0xff] }
  0x27   : > { %640 = vmatpush.msra.mxu3 %v611_v18  ;;  %593 = vmatpush.msra.mxu2 %v572_v44  ;;  %v696_v53 = vld [vmem:[#allocation4 + $0x158] sm:$0xff]  ;;  %v695_v56 = vld [vmem:[#allocation4 + $0x150] sm:$0xff]  ;;  %v568_v57 = vld [vmem:[#allocation4 + $0x88] sm:$0xff] }
  0x28   : > { %717 = vmatpush.msrb.mxu1 %v700_v37  ;;  %529 = vmatpush.msra.mxu0 %v499_v39  ;;  %v656_v58 = vld [vmem:[#allocation4 + $0x128] sm:$0xff]  ;;  %v567_v60 = vld [vmem:[#allocation4 + $0x80] sm:$0xff]  ;;  %v654_v63 = vld [vmem:[#allocation4 + $0x118] sm:$0xff] }
  0x29   : > { %801 = vmatpush.msrb.mxu3 %v784_v28  ;;  %594 = vmatpush.msra.mxu2 %v571_v48  ;;  %v694_v59 = vld [vmem:[#allocation4 + $0x148] sm:$0xff]  ;;  %v655_v61 = vld [vmem:[#allocation4 + $0x120] sm:$0xff]  ;;  %v744_v1 = vld [vmem:[#allocation4 + $0x1b8] sm:$0xff] }
  0x2a   : > { %718 = vmatpush.msrb.mxu1 %v699_v41  ;;  %530 = vmatpush.msra.mxu0 %v498_v43  ;;  %v693_v62 = vld [vmem:[#allocation4 + $0x140] sm:$0xff]  ;;  %v653_v2 = vld [vmem:[#allocation4 + $0x110] sm:$0xff]  ;;  %v652_v4 = vld [vmem:[#allocation4 + $0x108] sm:$0xff] }
  0x2b   : > { %802 = vmatpush.msrb.mxu3 %v783_v30  ;;  %595 = vmatpush.msra.mxu2 %v570_v51  ;;  %v743_v3 = vld [vmem:[#allocation4 + $0x1b0] sm:$0xff]  ;;  %v742_v5 = vld [vmem:[#allocation4 + $0x1a8] sm:$0xff]  ;;  %v651_v6 = vld [vmem:[#allocation4 + $0x100] sm:$0xff] }
  0x2c   : > { %719 = vmatpush.msrb.mxu1 %v698_v45  ;;  %531 = vmatpush.msra.mxu0 %v497_v47  ;;  %v741_v7 = vld [vmem:[#allocation4 + $0x1a0] sm:$0xff]  ;;  %v740_v9 = vld [vmem:[#allocation4 + $0x198] sm:$0xff]  ;;  %v739_v10 = vld [vmem:[#allocation4 + $0x190] sm:$0xff] }
  0x2d   : > { %803 = vmatpush.msrb.mxu3 %v782_v32  ;;  %596 = vmatpush.msra.mxu2 %v569_v54  ;;  %v738_v11 = vld [vmem:[#allocation4 + $0x188] sm:$0xff]  ;;  %v737_v12 = vld [vmem:[#allocation4 + $0x180] sm:$0xff]  ;;  %v826_v16 = vld [vmem:[#allocation4 + $0x238] sm:$0xff] }
  0x2e   : > { %720 = vmatpush.msrb.mxu1 %v697_v49  ;;  %675 = vmatpush.msrb.mxu0 %v658_v52  ;;  %v825_v18 = vld [vmem:[#allocation4 + $0x230] sm:$0xff]  ;;  %v820_v27 = vld [vmem:[#allocation4 + $0x208] sm:$0xff]  ;;  %v819_v28 = vld [vmem:[#allocation4 + $0x200] sm:$0xff] }
  0x2f   : > { %804 = vmatpush.msrb.mxu3 %v781_v34  ;;  %597 = vmatpush.msra.mxu2 %v568_v57  ;;  %v969_v43 = vld [vmem:[%s2231_s6 + $0x78] sm:$0xff]  ;;  %v931_v45 = vld [vmem:[%s2230_s5 + $0x68] sm:$0xff]  ;;  %v930_v52 = vld [vmem:[%s2230_s5 + $0x60] sm:$0xff] }
  0x30   : > { %721 = vmatpush.msrb.mxu1 %v696_v53  ;;  %676 = vmatpush.msrb.mxu0 %v657_v55  ;;  %v967_v49 = vld [vmem:[%s2231_s6 + $0x68] sm:$0xff]  ;;  %v966_v54 = vld [vmem:[%s2231_s6 + $0x60] sm:$0xff]  ;;  %v929_v55 = vld [vmem:[%s2230_s5 + $0x58] sm:$0xff] }
  0x31   : > { %805 = vmatpush.msrb.mxu3 %v780_v38  ;;  %598 = vmatpush.msra.mxu2 %v567_v60  ;;  %v965_v57 = vld [vmem:[%s2231_s6 + $0x58] sm:$0xff]  ;;  %v1103_v0 = vld [vmem:[#allocation6 + $0xe8] sm:$0xff] }
  0x32   : > { %722 = vmatpush.msrb.mxu1 %v695_v56  ;;  %677 = vmatpush.msrb.mxu0 %v656_v58 }
  0x33   : > { %806 = vmatpush.msrb.mxu3 %v779_v42  ;;  %759 = vmatpush.msrb.mxu2 %v744_v1  ;;  %v933_v42 = vld [vmem:[%s2230_s5 + $0x78] sm:$0xff] }
  0x34   : > { %723 = vmatpush.msrb.mxu1 %v694_v59  ;;  %678 = vmatpush.msrb.mxu0 %v655_v61  ;;  %v928_v59 = vld [vmem:[%s2230_s5 + $0x50] sm:$0xff] }
  0x35   : > { %807 = vmatpush.msrb.mxu3 %v778_v46  ;;  %760 = vmatpush.msrb.mxu2 %v743_v3  ;;  %v968_v46 = vld [vmem:[%s2231_s6 + $0x70] sm:$0xff] }
  0x36   : > { %724 = vmatpush.msrb.mxu1 %v693_v62  ;;  %679 = vmatpush.msrb.mxu0 %v654_v63  ;;  %v964_v61 = vld [vmem:[%s2231_s6 + $0x50] sm:$0xff]  ;;  %v927_v63 = vld [vmem:[%s2230_s5 + $0x48] sm:$0xff] }
  0x37   : > { %808 = vmatpush.msrb.mxu3 %v777_v50  ;;  %761 = vmatpush.msrb.mxu2 %v742_v5  ;;  %v926_v5 = vld [vmem:[%s2230_s5 + $0x40] sm:$0xff] }
  0x38   : > { %680 = vmatpush.msrb.mxu0 %v653_v2  ;;  %v963_v2 = vld [vmem:[%s2231_s6 + $0x48] sm:$0xff] }
  0x39   : > { %762 = vmatpush.msrb.mxu2 %v741_v7 }
  0x3a   : > { %681 = vmatpush.msrb.mxu0 %v652_v4 }
  0x3b   : > { %763 = vmatpush.msrb.mxu2 %v740_v9  ;;  %v925_v9 = vld [vmem:[%s2230_s5 + $0x38] sm:$0xff] }
  0x3c   : > { %682 = vmatpush.msrb.mxu0 %v651_v6 }
  0x3d   : > { %764 = vmatpush.msrb.mxu2 %v739_v10  ;;  %v961_v10 = vld [vmem:[%s2231_s6 + $0x38] sm:$0xff] }
  0x3f   : > { %765 = vmatpush.msrb.mxu2 %v738_v11 }
  0x41   : > { %766 = vmatpush.msrb.mxu2 %v737_v12  ;;  %v924_v12 = vld [vmem:[%s2230_s5 + $0x30] sm:$0xff] }
  0x8f   : > { %v478_v19 = vpop.permute.xlu0 %477 }
  0x90   : > { %484 = vst.msk [vmem:[#allocation2 + $0x1] sm:$0xff] %vm483_vm2, %v478_v19  ;;  %v824_v19 = vld [vmem:[#allocation4 + $0x228] sm:$0xff] }
  0x97   : > { %v480_v20 = vpop.permute.xlu0 %479  ;;  %v608_v21 = vld [vmem:[#allocation2 + $0x1] sm:$0xff] }
  0x98   : > { %v486_v22 = vld [vmem:[#allocation2] sm:$0xff]  ;;  %485 = vst.msk [vmem:[#allocation2 + $0x9] sm:$0xff] %vm483_vm2, %v480_v20  ;;  %659 = vrot.lane.b32.xlu0 %v608_v21, %s1889_s15  ;;  %1677 = vmatmul.msk.f32.vlgmr.msra.gmra.mxu3 %vm511_vm3, %v608_v21  ;;  %v823_v20 = vld [vmem:[#allocation4 + $0x220] sm:$0xff] }
  0x99   : > { %507 = vrot.lane.b32.xlu1 %v486_v22, %s1889_s15  ;;  %1673 = vmatmul.msk.f32.vlgmr.msra.gmra.mxu1 %vm511_vm3, %v486_v22 }
  0x9a   : > { %934 = vmatpush.msra.mxu3 %v933_v42  ;;  %v954_v42 = vld [vmem:[%s2231_s6] sm:$0xff] }
  0x9f   : > { %v487_v23 = vld [vmem:[#allocation2 + $0x8] sm:$0xff] }
  0xa0   : > { %701 = vrot.lane.b32.xlu0 %v608_v21, %s1890_s16  ;;  %509 = vrot.lane.b32.xlu2 %v487_v23, %s1889_s15  ;;  %v609_v24 = vld [vmem:[#allocation2 + $0x9] sm:$0xff] }
  0xa1   : > { %575 = vrot.lane.b32.xlu1 %v486_v22, %s1890_s16  ;;  %1674 = vmatmul.msk.f32.gmra.mxu1 %vm511_vm3, %v487_v23  ;;  %v2027_v25 = vld [vmem:[#allocation2 + $0xa] sm:$0xff]  ;;  %v2029_v26 = vld [vmem:[#allocation2 + $0x2] sm:$0xff] }
  0xa2   : > { %1678 = vmatmul.msk.f32.gmra.mxu3 %vm511_vm3, %v609_v24  ;;  %v822_v22 = vld [vmem:[#allocation4 + $0x218] sm:$0xff] }
  0xa8   : > { %577 = vrot.lane.b32.xlu2 %v487_v23, %s1890_s16  ;;  %703 = vrot.lane.b32.xlu0 %v609_v24, %s1890_s16 }
  0xa9   : > { %661 = vrot.lane.b32.xlu1 %v609_v24, %s1889_s15  ;;  %v821_v24 = vld [vmem:[#allocation4 + $0x210] sm:$0xff] }
  0xb0   : > { %785 = vrot.lane.b32.xlu2 %v2029_v26, %s1889_s15 }
  0xb1   : > { %787 = vrot.lane.b32.xlu1 %v2027_v25, %s1889_s15 }
  0xb8   : > { %827 = vrot.lane.b32.xlu2 %v2029_v26, %s1890_s16 }
  0xb9   : > { %829 = vrot.lane.b32.xlu1 %v2027_v25, %s1890_s16 }
  0xfa   : > { %v510_v8 = vpop.permute.xlu2 %509 }
 0x102   : > { %v578_v13 = vpop.permute.xlu2 %577 }
 0x10a   : > { %v660_v14 = vpop.permute.xlu0 %659  ;;  %v786_v15 = vpop.permute.xlu2 %785 }
 0x10b   : > { %v508_v17 = vpop.permute.xlu1 %507  ;;  %1685 = vmatmul.msk.f32.vlgmr.msrb.gmra.mxu3 %vm511_vm3, %v786_v15  ;;  %v960_v15 = vld [vmem:[%s2231_s6 + $0x30] sm:$0xff] }
 0x10c   : > { %1671 = vmatmul.msk.f32.vlgmr.msra.gmra.mxu0 %vm511_vm3, %v508_v17  ;;  %v923_v17 = vld [vmem:[%s2230_s5 + $0x28] sm:$0xff] }
 0x10d   : > { %843 = vmatpush.msra.mxu0 %v826_v16 }
 0x10f   : > { %844 = vmatpush.msra.mxu0 %v825_v18 }
 0x111   : > { %845 = vmatpush.msra.mxu0 %v824_v19  ;;  %v959_v19 = vld [vmem:[%s2231_s6 + $0x28] sm:$0xff] }
 0x112   : > { %v702_v21 = vpop.permute.xlu0 %701  ;;  %v828_v32 = vpop.permute.xlu2 %827 }
 0x113   : > { %v576_v23 = vpop.permute.xlu1 %575  ;;  %1681 = vmatmul.msk.f32.vlgmr.msrb.gmra.mxu1 %vm511_vm3, %v702_v21  ;;  %846 = vmatpush.msra.mxu0 %v823_v20  ;;  %v922_v21 = vld [vmem:[%s2230_s5 + $0x20] sm:$0xff] }
 0x114   : > { %1672 = vmatmul.msk.f32.gmra.mxu0 %vm511_vm3, %v510_v8  ;;  %1675 = vmatmul.msk.f32.vlgmr.msra.gmra.mxu2 %vm511_vm3, %v576_v23  ;;  %v962_v8 = vld [vmem:[%s2231_s6 + $0x40] sm:$0xff] }
 0x115   : > { %847 = vmatpush.msra.mxu0 %v822_v22  ;;  %v1754_v23 = vld [vmem:[%s2227_s2] ss:$0 sm:$0xff] }
 0x116   : > { %v560_v36 = vpop.f32.mrf.mxu1 }
 0x117   : > { %848 = vmatpush.msra.mxu0 %v821_v24 }
 0x119   : > { %849 = vmatpush.msra.mxu0 %v820_v27 }
 0x11a   : > { %v704_v29 = vpop.permute.xlu0 %703 }
 0x11b   : > { %v662_v30 = vpop.permute.xlu1 %661  ;;  %1682 = vmatmul.msk.f32.gmra.mxu1 %vm511_vm3, %v704_v29  ;;  %850 = vmatpush.msra.mxu0 %v819_v28  ;;  %v642_v38 = vpop.f32.mrf.mxu3  ;;  %v921_v28 = vld [vmem:[%s2230_s5 + $0x18] sm:$0xff] }
 0x11c   : > { %1676 = vmatmul.msk.f32.gmra.mxu2 %vm511_vm3, %v578_v13  ;;  %1679 = vmatmul.msk.f32.vlgmr.msrb.gmra.mxu0 %vm511_vm3, %v660_v14 }
 0x11d   : > { %970 = vmatpush.msrb.mxu0 %v969_v43 }
 0x11f   : > { %971 = vmatpush.msrb.mxu0 %v968_v46  ;;  %v1004_v46 = vld [vmem:[#allocation6 + $0x30] sm:$0xff] }
 0x121   : > { %972 = vmatpush.msrb.mxu0 %v967_v49  ;;  %v1001_v49 = vld [vmem:[#allocation6 + $0x18] sm:$0xff] }
 0x123   : > { %v788_v31 = vpop.permute.xlu1 %787  ;;  %973 = vmatpush.msrb.mxu0 %v966_v54 }
 0x124   : > { %1680 = vmatmul.msk.f32.gmra.mxu0 %vm511_vm3, %v662_v30  ;;  %1683 = vmatmul.msk.f32.vlgmr.msrb.gmra.mxu2 %vm511_vm3, %v2029_v26  ;;  %v563_v26 = vpop.f32.mrf.mxu1  ;;  %v920_v30 = vld [vmem:[%s2230_s5 + $0x10] sm:$0xff] }
 0x125   : > { %1686 = vmatmul.msk.f32.gmra.mxu3 %vm511_vm3, %v788_v31  ;;  %v645_v50 = vpop.f32.mrf.mxu3  ;;  %974 = vmatpush.msrb.mxu0 %v965_v57  ;;  %v1104_v57 = vld [vmem:[#allocation6 + $0xf0] sm:$0xff] }
 0x127   : > { %975 = vmatpush.msrb.mxu0 %v964_v61  ;;  %v1099_v61 = vld [vmem:[#allocation6 + $0xc8] sm:$0xff] }
 0x129   : > { %976 = vmatpush.msrb.mxu0 %v963_v2  ;;  %v1012_v2 = vld [vmem:[#allocation6 + $0x68] sm:$0xff] }
 0x12b   : > { %v830_v33 = vpop.permute.xlu1 %829  ;;  %977 = vmatpush.msrb.mxu0 %v962_v8  ;;  %v1138_v8 = vld [vmem:[#allocation6 + $0x138] sm:$0xff] }
 0x12c   : > { %1684 = vmatmul.msk.f32.gmra.mxu2 %vm511_vm3, %v2027_v25  ;;  %1687 = vmatmul.msk.f32.vlgmr.msra.gmra.mxu0 %vm511_vm3, %v828_v32  ;;  %v932_v25 = vld [vmem:[%s2230_s5 + $0x70] sm:$0xff] }
 0x12d   : > { %935 = vmatpush.msra.mxu3 %v932_v25  ;;  %978 = vmatpush.msrb.mxu0 %v961_v10  ;;  %v1137_v10 = vld [vmem:[#allocation6 + $0x130] sm:$0xff] }
 0x12f   : > { %936 = vmatpush.msra.mxu3 %v931_v45  ;;  %979 = vmatpush.msrb.mxu0 %v960_v15  ;;  %v1005_v45 = vld [vmem:[#allocation6 + $0x38] sm:$0xff]  ;;  %v1007_v15 = vld [vmem:[#allocation6 + $0x40] sm:$0xff] }
 0x131   : > { %937 = vmatpush.msra.mxu3 %v930_v52  ;;  %980 = vmatpush.msrb.mxu0 %v959_v19  ;;  %v1133_v19 = vld [vmem:[#allocation6 + $0x110] sm:$0xff] }
 0x133   : > { %938 = vmatpush.msra.mxu3 %v929_v55  ;;  %v998_v55 = vld [vmem:[#allocation6] sm:$0xff] }
 0x134   : > { %1688 = vmatmul.msk.f32.gmra.mxu0 %vm511_vm3, %v830_v33 }
 0x135   : > { %939 = vmatpush.msra.mxu3 %v928_v59  ;;  %v1101_v59 = vld [vmem:[#allocation6 + $0xd8] sm:$0xff] }
 0x137   : > { %940 = vmatpush.msra.mxu3 %v927_v63  ;;  %v1014_v63 = vld [vmem:[#allocation6 + $0x78] sm:$0xff] }
 0x139   : > { %941 = vmatpush.msra.mxu3 %v926_v5 }
 0x13b   : > { %942 = vmatpush.msra.mxu3 %v925_v9  ;;  %v1010_v9 = vld [vmem:[#allocation6 + $0x58] sm:$0xff] }
 0x13d   : > { %943 = vmatpush.msra.mxu3 %v924_v12  ;;  %v1136_v12 = vld [vmem:[#allocation6 + $0x128] sm:$0xff] }
 0x13f   : > { %944 = vmatpush.msra.mxu3 %v923_v17  ;;  %v1134_v17 = vld [vmem:[#allocation6 + $0x118] sm:$0xff] }
 0x141   : > { %945 = vmatpush.msra.mxu3 %v922_v21  ;;  %v1172_v21 = vld [vmem:[#allocation6 + $0x178] sm:$0xff] }
 0x143   : > { %946 = vmatpush.msra.mxu3 %v921_v28  ;;  %v1239_v28 = vld [vmem:[#allocation6 + $0x1f0] sm:$0xff] }
 0x145   : > { %947 = vmatpush.msra.mxu3 %v920_v30  ;;  %v1170_v30 = vld [vmem:[#allocation6 + $0x168] sm:$0xff] }
 0x189   : > { %v533_v34 = vpop.f32.mrf.mxu0 }
 0x18a   : > { %v561_v40 = vadd.f32 %v560_v36, %v533_v34  ;;  %v868_v36 = vld [vmem:[%s2228_s3] sm:$0xff] }
 0x18e   : > { %v810_v3 = vpop.f32.mrf.mxu3 }
 0x190   : > { %v726_v58 = vpop.f32.mrf.mxu1 }
 0x191   : > { %v536_v35 = vpop.f32.mrf.mxu0 }
 0x192   : > { %v564_v47 = vadd.f32 %v563_v26, %v536_v35  ;;  %v893_v35 = vld [vmem:[%s2229_s4] sm:$0xff] }
 0x193   : > { %v918_v26 = vld [vmem:[%s2230_s5] sm:$0xff] }
 0x197   : > { %v600_v37 = vpop.f32.mrf.mxu2 }
 0x198   : > { %v606_v41 = vadd.f32 %v600_v37, %v561_v40  ;;  %v729_v11 = vpop.f32.mrf.mxu1  ;;  %v958_v37 = vld [vmem:[%s2231_s6 + $0x20] sm:$0xff]  ;;  %v919_v40 = vld [vmem:[%s2230_s5 + $0x8] sm:$0xff] }
 0x199   : > { %v684_v39 = vpop.f32.mrf.mxu0  ;;  %981 = vmatpush.msrb.mxu0 %v958_v37  ;;  %948 = vmatpush.msra.mxu3 %v919_v40  ;;  %v1272_v37 = vld [vmem:[#allocation6 + $0x228] sm:$0xff]  ;;  %v1237_v40 = vld [vmem:[#allocation6 + $0x1e0] sm:$0xff] }
 0x19a   : > { %v648_v48 = vadd.f32 %v642_v38, %v606_v41  ;;  %v957_v38 = vld [vmem:[%s2231_s6 + $0x18] sm:$0xff]  ;;  %v955_v41 = vld [vmem:[%s2231_s6 + $0x8] sm:$0xff] }
 0x19b   : > { %982 = vmatpush.msrb.mxu0 %v957_v38  ;;  %949 = vmatpush.msra.mxu3 %v918_v26  ;;  %v1064_v38 = vld [vmem:[#allocation6 + $0x88] sm:$0xff]  ;;  %v1168_v26 = vld [vmem:[#allocation6 + $0x158] sm:$0xff] }
 0x19c   : > { %v690_v56 = vadd.f32 %v684_v39, %v648_v48  ;;  %v956_v39 = vld [vmem:[%s2231_s6 + $0x10] sm:$0xff]  ;;  %v1002_v48 = vld [vmem:[#allocation6 + $0x20] sm:$0xff] }
 0x19d   : > { %983 = vmatpush.msrb.mxu0 %v956_v39  ;;  %1151 = vmatpush.msrb.mxu3 %v1138_v8  ;;  %v1271_v39 = vld [vmem:[#allocation6 + $0x220] sm:$0xff] }
 0x19e   : > { %v732_v1 = vadd.f32 %v726_v58, %v690_v56  ;;  %v1105_v56 = vld [vmem:[#allocation6 + $0xf8] sm:$0xff]  ;;  %v1102_v58 = vld [vmem:[#allocation6 + $0xe0] sm:$0xff] }
 0x19f   : > { %v603_v44 = vpop.f32.mrf.mxu2  ;;  %984 = vmatpush.msrb.mxu0 %v955_v41  ;;  %1152 = vmatpush.msrb.mxu3 %v1137_v10  ;;  %v1063_v41 = vld [vmem:[#allocation6 + $0x80] sm:$0xff]  ;;  %v1389_v10 = vld [vmem:[#allocation8 + $0x1d0] sm:$0xff] }
 0x1a0   : > { %v607_v53 = vadd.f32 %v603_v44, %v564_v47  ;;  %v1003_v47 = vld [vmem:[#allocation6 + $0x28] sm:$0xff]  ;;  %v1387_v8 = vld [vmem:[#allocation8 + $0x1c0] sm:$0xff] }
 0x1a1   : > { %v687_v51 = vpop.f32.mrf.mxu0  ;;  %985 = vmatpush.msrb.mxu0 %v954_v42  ;;  %1153 = vmatpush.msrb.mxu3 %v1136_v12  ;;  %v1236_v42 = vld [vmem:[#allocation6 + $0x1d8] sm:$0xff]  ;;  %v1384_v12 = vld [vmem:[#allocation8 + $0x1a8] sm:$0xff] }
 0x1a2   : > { %v649_v60 = vadd.f32 %v645_v50, %v607_v53  ;;  %v1000_v50 = vld [vmem:[#allocation6 + $0x10] sm:$0xff] }
 0x1a3   : > { %1185 = vmatpush.msra.mxu0 %v1172_v21 }
 0x1a4   : > { %v691_v6 = vadd.f32 %v687_v51, %v649_v60  ;;  %v999_v51 = vld [vmem:[#allocation6 + $0x8] sm:$0xff]  ;;  %v1100_v60 = vld [vmem:[#allocation6 + $0xd0] sm:$0xff] }
 0x1a6   : > { %v733_v13 = vadd.f32 %v729_v11, %v691_v6  ;;  %v1009_v11 = vld [vmem:[#allocation6 + $0x50] sm:$0xff] }
 0x1a7   : > { %v768_v62 = vpop.f32.mrf.mxu2 }
 0x1a8   : > { %v774_v7 = vadd.f32 %v768_v62, %v732_v1  ;;  %v813_v20 = vpop.f32.mrf.mxu3  ;;  %v1098_v62 = vld [vmem:[#allocation6 + $0xc0] sm:$0xff]  ;;  %v1013_v1 = vld [vmem:[#allocation6 + $0x70] sm:$0xff] }
 0x1a9   : > { %v852_v4 = vpop.f32.mrf.mxu0 }
 0x1aa   : > { %v816_v14 = vadd.f32 %v810_v3, %v774_v7  ;;  %v1011_v7 = vld [vmem:[#allocation6 + $0x60] sm:$0xff] }
 0x1ac   : > { %v858_v22 = vadd.f32 %v852_v4, %v816_v14  ;;  %v1135_v14 = vld [vmem:[#allocation6 + $0x120] sm:$0xff] }
 0x1ad   : > { %1154 = vmatpush.msrb.mxu3 %v1135_v14  ;;  %v1380_v14 = vld [vmem:[#allocation8 + $0x188] sm:$0xff] }
 0x1ae   : > { %v864_v31 = vadd.f32 %v1754_v23, %v858_v22  ;;  %v1240_v22 = vld [vmem:[#allocation6 + $0x1f8] sm:$0xff] }
 0x1af   : > { %v771_v16 = vpop.f32.mrf.mxu2  ;;  %1155 = vmatpush.msrb.mxu3 %v1134_v17 }
 0x1b0   : > { %v775_v18 = vadd.f32 %v771_v16, %v733_v13  ;;  %v866_v34 = vmax.f32 %v864_v31, 0.0  ;;  %v1008_v13 = vld [vmem:[#allocation6 + $0x48] sm:$0xff]  ;;  %v1070_v16 = vld [vmem:[#allocation6 + $0xb8] sm:$0xff] }
 0x1b1   : > { %v855_v27 = vpop.f32.mrf.mxu0  ;;  %1156 = vmatpush.msrb.mxu3 %v1133_v19  ;;  %v1238_v31 = vld [vmem:[#allocation6 + $0x1e8] sm:$0xff] }
 0x1b2   : > { %v817_v24 = vadd.f32 %v813_v20, %v775_v18  ;;  %v1069_v18 = vld [vmem:[#allocation6 + $0xb0] sm:$0xff]  ;;  %v1068_v20 = vld [vmem:[#allocation6 + $0xa8] sm:$0xff] }
 0x1b3   : > { %v1376_v19 = vld [vmem:[#allocation8 + $0x168] sm:$0xff] }
 0x1b4   : > { %v859_v29 = vadd.f32 %v855_v27, %v817_v24  ;;  %v1171_v24 = vld [vmem:[#allocation6 + $0x170] sm:$0xff]  ;;  %v1067_v27 = vld [vmem:[#allocation6 + $0xa0] sm:$0xff] }
 0x1b5   : > { %1186 = vmatpush.msra.mxu0 %v1171_v24  ;;  %v1371_v24 = vld [vmem:[#allocation8 + $0x140] sm:$0xff] }
 0x1b6   : > { %v865_v32 = vadd.f32 %v1754_v23, %v859_v29  ;;  %v1132_v23 = vld [vmem:[#allocation6 + $0x108] sm:$0xff]  ;;  %v1131_v29 = vld [vmem:[#allocation6 + $0x100] sm:$0xff] }
 0x1b7   : > { %1157 = vmatpush.msrb.mxu3 %v1132_v23  ;;  %1187 = vmatpush.msra.mxu0 %v1170_v30  ;;  %v1367_v30 = vld [vmem:[#allocation8 + $0x120] sm:$0xff] }
 0x1b8   : > { %v867_v33 = vmax.f32 %v865_v32, 0.0  ;;  %v1274_v32 = vld [vmem:[#allocation6 + $0x238] sm:$0xff] }
 0x1b9   : > { %1158 = vmatpush.msrb.mxu3 %v1131_v29 }
 0x1ba   : > { %887 = vmatpush.msra.mxu1 %v867_v33  ;;  %911 = vmatpush.msra.mxu2 %v867_v33  ;;  %v1066_v33 = vld [vmem:[#allocation6 + $0x98] sm:$0xff] }
 0x1bc   : > { %888 = vmatpush.msra.mxu1 %v866_v34  ;;  %912 = vmatpush.msra.mxu2 %v866_v34  ;;  %v1169_v34 = vld [vmem:[#allocation6 + $0x160] sm:$0xff] }
 0x1bd   : > { %1690 = vmatmul.msk.f32.vlgmr.msra.gmra.mxu2 %vm869_vm4, %v893_v35  ;;  %1689 = vmatmul.msk.f32.vlgmr.msra.gmra.mxu1 %vm869_vm4, %v868_v36  ;;  %v1273_v35 = vld [vmem:[#allocation6 + $0x230] sm:$0xff] }
 0x1be   : > { %1050 = vmatpush.msrb.mxu2 %v1005_v45  ;;  %1028 = vmatpush.msrb.mxu1 %v1014_v63  ;;  %v1065_v36 = vld [vmem:[#allocation6 + $0x90] sm:$0xff]  ;;  %v1201_v63 = vld [vmem:[#allocation6 + $0x188] sm:$0xff] }
 0x1bf   : > { %1188 = vmatpush.msra.mxu0 %v1169_v34  ;;  %v1269_v45 = vld [vmem:[#allocation6 + $0x210] sm:$0xff] }
 0x1c0   : > { %1051 = vmatpush.msrb.mxu2 %v1004_v46  ;;  %1029 = vmatpush.msrb.mxu1 %v1013_v1  ;;  %v1166_v46 = vld [vmem:[#allocation6 + $0x148] sm:$0xff]  ;;  %v1200_v1 = vld [vmem:[#allocation6 + $0x180] sm:$0xff] }
 0x1c1   : > { %1189 = vmatpush.msra.mxu0 %v1168_v26  ;;  %v1361_v26 = vld [vmem:[#allocation8 + $0xf0] sm:$0xff] }
 0x1c2   : > { %1052 = vmatpush.msrb.mxu2 %v1003_v47  ;;  %1030 = vmatpush.msrb.mxu1 %v1012_v2  ;;  %v1234_v47 = vld [vmem:[#allocation6 + $0x1c8] sm:$0xff] }
 0x1c4   : > { %1053 = vmatpush.msrb.mxu2 %v1002_v48  ;;  %1031 = vmatpush.msrb.mxu1 %v1011_v7  ;;  %v1268_v48 = vld [vmem:[#allocation6 + $0x208] sm:$0xff]  ;;  %v1393_v7 = vld [vmem:[#allocation8 + $0x1f0] sm:$0xff] }
 0x1c6   : > { %1054 = vmatpush.msrb.mxu2 %v1001_v49  ;;  %1032 = vmatpush.msrb.mxu1 %v1010_v9  ;;  %v1165_v49 = vld [vmem:[#allocation6 + $0x140] sm:$0xff]  ;;  %v1388_v9 = vld [vmem:[#allocation8 + $0x1c8] sm:$0xff] }
 0x1c8   : > { %1055 = vmatpush.msrb.mxu2 %v1000_v50  ;;  %1033 = vmatpush.msrb.mxu1 %v1009_v11  ;;  %v1267_v50 = vld [vmem:[#allocation6 + $0x200] sm:$0xff] }
 0x1c9   : > { %v1383_v11 = vld [vmem:[#allocation8 + $0x1a0] sm:$0xff] }
 0x1ca   : > { %1056 = vmatpush.msrb.mxu2 %v999_v51  ;;  %1034 = vmatpush.msrb.mxu1 %v1008_v13  ;;  %v1233_v51 = vld [vmem:[#allocation6 + $0x1c0] sm:$0xff]  ;;  %v1385_v13 = vld [vmem:[#allocation8 + $0x1b0] sm:$0xff] }
 0x1cc   : > { %1057 = vmatpush.msrb.mxu2 %v998_v55  ;;  %1035 = vmatpush.msrb.mxu1 %v1007_v15  ;;  %v1381_v15 = vld [vmem:[#allocation8 + $0x190] sm:$0xff] }
 0x1ce   : > { %1117 = vmatpush.msra.mxu2 %v1105_v56  ;;  %1083 = vmatpush.msra.mxu1 %v1070_v16  ;;  %v1206_v56 = vld [vmem:[#allocation6 + $0x1b0] sm:$0xff] }
 0x1d0   : > { %1118 = vmatpush.msra.mxu2 %v1104_v57  ;;  %1084 = vmatpush.msra.mxu1 %v1069_v18  ;;  %v1205_v57 = vld [vmem:[#allocation6 + $0x1a8] sm:$0xff]  ;;  %v1375_v18 = vld [vmem:[#allocation8 + $0x160] sm:$0xff] }
 0x1d2   : > { %1119 = vmatpush.msra.mxu2 %v1103_v0  ;;  %1085 = vmatpush.msra.mxu1 %v1068_v20  ;;  %v1204_v0 = vld [vmem:[#allocation6 + $0x1a0] sm:$0xff]  ;;  %v1377_v20 = vld [vmem:[#allocation8 + $0x170] sm:$0xff] }
 0x1d4   : > { %1120 = vmatpush.msra.mxu2 %v1102_v58  ;;  %1086 = vmatpush.msra.mxu1 %v1067_v27  ;;  %v1372_v27 = vld [vmem:[#allocation8 + $0x148] sm:$0xff] }
 0x1d6   : > { %1121 = vmatpush.msra.mxu2 %v1101_v59  ;;  %1087 = vmatpush.msra.mxu1 %v1066_v33  ;;  %v1203_v59 = vld [vmem:[#allocation6 + $0x198] sm:$0xff] }
 0x1d8   : > { %1122 = vmatpush.msra.mxu2 %v1100_v60  ;;  %1088 = vmatpush.msra.mxu1 %v1065_v36  ;;  %v1364_v36 = vld [vmem:[#allocation8 + $0x108] sm:$0xff] }
 0x1da   : > { %1123 = vmatpush.msra.mxu2 %v1099_v61  ;;  %1089 = vmatpush.msra.mxu1 %v1064_v38 }
 0x1dc   : > { %1124 = vmatpush.msra.mxu2 %v1098_v62  ;;  %1090 = vmatpush.msra.mxu1 %v1063_v41  ;;  %v1202_v62 = vld [vmem:[#allocation6 + $0x190] sm:$0xff]  ;;  %v1360_v41 = vld [vmem:[#allocation8 + $0xe8] sm:$0xff] }
 0x23a   : > { %v890_v25 = vpop.f32.mrf.mxu1 }
 0x240   : > { %v914_v43 = vpop.f32.mrf.mxu2 }
 0x241   : > { %v917_v44 = vmax.f32 %v890_v25, %v914_v43  ;;  %v1270_v25 = vld [vmem:[#allocation6 + $0x218] sm:$0xff]  ;;  %v1167_v43 = vld [vmem:[#allocation6 + $0x150] sm:$0xff] }
 0x242   : > { %1190 = vmatpush.msra.mxu0 %v1167_v43  ;;  %v1355_v43 = vld [vmem:[#allocation8 + $0xc0] sm:$0xff] }
 0x243   : > { %950 = vmatmul.f32.vlgmr.msra.gmra.mxu3 %v917_v44  ;;  %986 = vmatmul.f32.vlgmr.msrb.gmra.mxu0 %v917_v44  ;;  %v1235_v44 = vld [vmem:[#allocation6 + $0x1d0] sm:$0xff] }
 0x244   : > { %1287 = vmatpush.msra.mxu3 %v1274_v32  ;;  %1191 = vmatpush.msra.mxu0 %v1166_v46  ;;  %v1369_v32 = vld [vmem:[#allocation8 + $0x130] sm:$0xff] }
 0x246   : > { %1288 = vmatpush.msra.mxu3 %v1273_v35  ;;  %1192 = vmatpush.msra.mxu0 %v1165_v49  ;;  %v1363_v35 = vld [vmem:[#allocation8 + $0x100] sm:$0xff] }
 0x247   : > { %v1351_v49 = vld [vmem:[#allocation8 + $0xa0] sm:$0xff] }
 0x248   : > { %1289 = vmatpush.msra.mxu3 %v1272_v37  ;;  %v1365_v37 = vld [vmem:[#allocation8 + $0x110] sm:$0xff] }
 0x24a   : > { %1290 = vmatpush.msra.mxu3 %v1271_v39 }
 0x24c   : > { %1291 = vmatpush.msra.mxu3 %v1270_v25 }
 0x24e   : > { %1292 = vmatpush.msra.mxu3 %v1269_v45  ;;  %v1357_v45 = vld [vmem:[#allocation8 + $0xd0] sm:$0xff] }
 0x250   : > { %1293 = vmatpush.msra.mxu3 %v1268_v48 }
 0x252   : > { %1294 = vmatpush.msra.mxu3 %v1267_v50  ;;  %v1352_v50 = vld [vmem:[#allocation8 + $0xa8] sm:$0xff] }
 0x2c0   : > { %v987_v53 = vpop.f32.mrf.mxu0 }
 0x2c6   : > { %v951_v52 = vpop.f32.mrf.mxu3 }
 0x2c7   : > { %v990_v54 = vmax.f32 %v951_v52, %v987_v53 }
 0x2c9   : > { %992 = vrot.lane.b32.xlu2 %v990_v54, %s1891_s17  ;;  %v1207_v54 = vld [vmem:[#allocation6 + $0x1b8] sm:$0xff] }
 0x323   : > { %v993_v3 = vpop.permute.xlu2 %992 }
 0x324   : > { %996 = vst.msk [vmem:[#allocation3 + $0x1] sm:$0xff] %vm995_vm7, %v993_v3 }
 0x32b   : > { %v1096_v4 = vld [vmem:[#allocation3 + $0x1] sm:$0xff] }
 0x32c   : > { %v997_v5 = vld [vmem:[#allocation3] sm:$0xff]  ;;  %1139 = vrot.lane.b32.xlu1 %v1096_v4, %s1890_s16 }
 0x32d   : > { %1071 = vrot.lane.b32.xlu2 %v997_v5, %s1892_s18  ;;  %1016 = vrot.lane.b32.xlu0 %v997_v5, %s1890_s16  ;;  %v2163_v6 = vld [vmem:[#allocation3 + $0x2] sm:$0xff] }
 0x32e   : > { %1692 = vmatmul.msk.f32.vlgmr.msrb.gmra.mxu2 %vm511_vm3, %v997_v5  ;;  %v1392_v5 = vld [vmem:[#allocation8 + $0x1e8] sm:$0xff] }
 0x32f   : > { %1253 = vmatpush.msrb.mxu2 %v1240_v22 }
 0x331   : > { %1254 = vmatpush.msrb.mxu2 %v1239_v28  ;;  %v1373_v28 = vld [vmem:[#allocation8 + $0x150] sm:$0xff] }
 0x333   : > { %1255 = vmatpush.msrb.mxu2 %v1238_v31  ;;  %v1368_v31 = vld [vmem:[#allocation8 + $0x128] sm:$0xff] }
 0x334   : > { %1173 = vrot.lane.b32.xlu1 %v1096_v4, %s1892_s18 }
 0x335   : > { %1275 = vrot.lane.b32.xlu2 %v2163_v6, %s1892_s18  ;;  %1241 = vrot.lane.b32.xlu0 %v2163_v6, %s1890_s16 }
 0x336   : > { %1694 = vmatmul.msk.f32.vlgmr.msra.gmra.mxu2 %vm511_vm3, %v1096_v4  ;;  %v1391_v4 = vld [vmem:[#allocation8 + $0x1e0] sm:$0xff] }
 0x337   : > { %1256 = vmatpush.msrb.mxu2 %v1237_v40  ;;  %v1359_v40 = vld [vmem:[#allocation8 + $0xe0] sm:$0xff] }
 0x339   : > { %1257 = vmatpush.msrb.mxu2 %v1236_v42 }
 0x33b   : > { %1258 = vmatpush.msrb.mxu2 %v1235_v44  ;;  %v1356_v44 = vld [vmem:[#allocation8 + $0xc8] sm:$0xff] }
 0x33d   : > { %1259 = vmatpush.msrb.mxu2 %v1234_v47  ;;  %v1755_v47 = vld [vmem:[%s2233_s8] ss:$0 sm:$0xff] }
 0x33f   : > { %1260 = vmatpush.msrb.mxu2 %v1233_v51  ;;  %v1353_v51 = vld [vmem:[#allocation8 + $0xb0] sm:$0xff] }
 0x341   : > { %1425 = vmatpush.msra.mxu2 %v1392_v5  ;;  %v1390_v5 = vld [vmem:[#allocation8 + $0x1d8] sm:$0xff] }
 0x343   : > { %1426 = vmatpush.msra.mxu2 %v1388_v9  ;;  %v1378_v9 = vld [vmem:[#allocation8 + $0x178] sm:$0xff] }
 0x345   : > { %1427 = vmatpush.msra.mxu2 %v1384_v12  ;;  %v1366_v12 = vld [vmem:[#allocation8 + $0x118] sm:$0xff] }
 0x347   : > { %1428 = vmatpush.msra.mxu2 %v1380_v14  ;;  %v1354_v14 = vld [vmem:[#allocation8 + $0xb8] sm:$0xff] }
 0x349   : > { %1429 = vmatpush.msra.mxu2 %v1376_v19  ;;  %v1331_v19 = vld [vmem:[#allocation8] sm:$0xff] }
 0x34b   : > { %1430 = vmatpush.msra.mxu2 %v1372_v27 }
 0x34d   : > { %1431 = vmatpush.msra.mxu2 %v1368_v31 }
 0x34f   : > { %1432 = vmatpush.msra.mxu2 %v1364_v36 }
 0x351   : > { %1433 = vmatpush.msra.mxu2 %v1360_v41 }
 0x353   : > { %1434 = vmatpush.msra.mxu2 %v1356_v44 }
 0x355   : > { %1435 = vmatpush.msra.mxu2 %v1352_v50 }
 0x387   : > { %v1072_v52 = vpop.permute.xlu2 %1071 }
 0x38f   : > { %v1276_v61 = vpop.permute.xlu2 %1275 }
 0x39e   : > { %v1140_v53 = vpop.permute.xlu1 %1139 }
 0x39f   : > { %v1017_v55 = vpop.permute.xlu0 %1016  ;;  %1695 = vmatmul.msk.f32.vlgmr.msrb.gmra.mxu3 %vm511_vm3, %v1140_v53  ;;  %v1347_v53 = vld [vmem:[#allocation8 + $0x80] sm:$0xff] }
 0x3a0   : > { %1691 = vmatmul.msk.f32.vlgmr.msrb.gmra.mxu1 %vm511_vm3, %v1017_v55  ;;  %1445 = vmatpush.msrb.mxu3 %v1393_v7  ;;  %v1349_v55 = vld [vmem:[#allocation8 + $0x90] sm:$0xff]  ;;  %v1386_v7 = vld [vmem:[#allocation8 + $0x1b8] sm:$0xff] }
 0x3a1   : > { %1219 = vmatpush.msrb.mxu1 %v1207_v54  ;;  %v1348_v54 = vld [vmem:[#allocation8 + $0x88] sm:$0xff] }
 0x3a2   : > { %1446 = vmatpush.msrb.mxu3 %v1389_v10  ;;  %1436 = vmatpush.msra.mxu2 %v1348_v54  ;;  %v1374_v10 = vld [vmem:[#allocation8 + $0x158] sm:$0xff] }
 0x3a3   : > { %1220 = vmatpush.msrb.mxu1 %v1206_v56 }
 0x3a4   : > { %1447 = vmatpush.msrb.mxu3 %v1385_v13  ;;  %v1362_v13 = vld [vmem:[#allocation8 + $0xf8] sm:$0xff] }
 0x3a5   : > { %1221 = vmatpush.msrb.mxu1 %v1205_v57  ;;  %v1343_v57 = vld [vmem:[#allocation8 + $0x60] sm:$0xff] }
 0x3a6   : > { %v1174_v58 = vpop.permute.xlu1 %1173  ;;  %1448 = vmatpush.msrb.mxu3 %v1381_v15  ;;  %v1350_v15 = vld [vmem:[#allocation8 + $0x98] sm:$0xff] }
 0x3a7   : > { %1222 = vmatpush.msrb.mxu1 %v1204_v0  ;;  %v1242_v60 = vpop.permute.xlu0 %1241  ;;  %1696 = vmatmul.msk.f32.vlgmr.msra.gmra.mxu0 %vm511_vm3, %v1174_v58  ;;  %v1344_v0 = vld [vmem:[#allocation8 + $0x68] sm:$0xff]  ;;  %v1345_v58 = vld [vmem:[#allocation8 + $0x70] sm:$0xff] }
 0x3a8   : > { %1693 = vmatmul.msk.f32.vlgmr.msra.gmra.mxu1 %vm511_vm3, %v1072_v52  ;;  %1698 = vmatmul.msk.f32.vlgmr.msrb.gmra.mxu2 %vm511_vm3, %v1242_v60  ;;  %v1340_v60 = vld [vmem:[#allocation8 + $0x48] sm:$0xff] }
 0x3a9   : > { %1699 = vmatmul.msk.f32.vlgmr.msra.gmra.mxu3 %vm511_vm3, %v1276_v61  ;;  %1223 = vmatpush.msrb.mxu1 %v1203_v59  ;;  %v1339_v59 = vld [vmem:[#allocation8 + $0x40] sm:$0xff]  ;;  %v1341_v61 = vld [vmem:[#allocation8 + $0x50] sm:$0xff] }
 0x3aa   : > { %1449 = vmatpush.msrb.mxu3 %v1377_v20  ;;  %1437 = vmatpush.msra.mxu2 %v1344_v0  ;;  %v1332_v20 = vld [vmem:[#allocation8 + $0x8] sm:$0xff] }
 0x3ab   : > { %1224 = vmatpush.msrb.mxu1 %v1202_v62  ;;  %v1335_v62 = vld [vmem:[#allocation8 + $0x20] sm:$0xff] }
 0x3ac   : > { %1450 = vmatpush.msrb.mxu3 %v1373_v28  ;;  %1438 = vmatpush.msra.mxu2 %v1340_v60 }
 0x3ad   : > { %1225 = vmatpush.msrb.mxu1 %v1201_v63  ;;  %v1336_v63 = vld [vmem:[#allocation8 + $0x28] sm:$0xff] }
 0x3ae   : > { %1451 = vmatpush.msrb.mxu3 %v1369_v32  ;;  %1439 = vmatpush.msra.mxu2 %v1336_v63 }
 0x3af   : > { %1226 = vmatpush.msrb.mxu1 %v1200_v1  ;;  %v1337_v1 = vld [vmem:[#allocation8 + $0x30] sm:$0xff] }
 0x3b0   : > { %1697 = vmatmul.msk.f32.vlgmr.msrb.gmra.mxu1 %vm511_vm3, %v2163_v6  ;;  %v1379_v6 = vld [vmem:[#allocation8 + $0x180] sm:$0xff]  ;;  %1452 = vmatpush.msrb.mxu3 %v1365_v37 }
 0x3b1   : > { %v1059_v2 = vpop.f32.mrf.mxu2  ;;  %1405 = vmatpush.msra.mxu1 %v1391_v4  ;;  %v1394_v4 = vld [vmem:[#allocation8 + $0x1f8] sm:$0xff]  ;;  %1440 = vmatpush.msra.mxu2 %v1332_v20 }
 0x3b2   : > { %1453 = vmatpush.msrb.mxu3 %v1361_v26 }
 0x3b3   : > { %1406 = vmatpush.msra.mxu1 %v1387_v8  ;;  %v1382_v8 = vld [vmem:[#allocation8 + $0x198] sm:$0xff] }
 0x3b4   : > { %1454 = vmatpush.msrb.mxu3 %v1357_v45 }
 0x3b5   : > { %1407 = vmatpush.msra.mxu1 %v1383_v11  ;;  %v1370_v11 = vld [vmem:[#allocation8 + $0x138] sm:$0xff] }
 0x3b6   : > { %1455 = vmatpush.msrb.mxu3 %v1353_v51 }
 0x3b7   : > { %1408 = vmatpush.msra.mxu1 %v1379_v6  ;;  %v1358_v6 = vld [vmem:[#allocation8 + $0xd8] sm:$0xff] }
 0x3b8   : > { %1456 = vmatpush.msrb.mxu3 %v1349_v55 }
 0x3b9   : > { %v1126_v22 = vpop.f32.mrf.mxu2  ;;  %1409 = vmatpush.msra.mxu1 %v1375_v18  ;;  %v1338_v18 = vld [vmem:[#allocation8 + $0x38] sm:$0xff] }
 0x3ba   : > { %1457 = vmatpush.msrb.mxu3 %v1345_v58 }
 0x3bb   : > { %1410 = vmatpush.msra.mxu1 %v1371_v24  ;;  %v1395_v24 = vld [vmem:[%s2236_s11] sm:$0xf] }
 0x3bc   : > { %1458 = vmatpush.msrb.mxu3 %v1341_v61  ;;  %v1397_v27 = vperm.slane %v1395_v24, 0  ;;  %v1400_v28 = vperm.slane %v1395_v24, 3  ;;  %v1399_v36 = vperm.slane %v1395_v24, 2 }
 0x3bd   : > { %1411 = vmatpush.msra.mxu1 %v1367_v30 }
 0x3be   : > { %1459 = vmatpush.msrb.mxu3 %v1337_v1 }
 0x3bf   : > { %1412 = vmatpush.msra.mxu1 %v1363_v35 }
 0x3c1   : > { %1413 = vmatpush.msra.mxu1 %v1359_v40 }
 0x3c3   : > { %1414 = vmatpush.msra.mxu1 %v1355_v43 }
 0x3c5   : > { %1415 = vmatpush.msra.mxu1 %v1351_v49 }
 0x3c7   : > { %1416 = vmatpush.msra.mxu1 %v1347_v53 }
 0x3c9   : > { %1417 = vmatpush.msra.mxu1 %v1343_v57 }
 0x3cb   : > { %1418 = vmatpush.msra.mxu1 %v1339_v59 }
 0x3cd   : > { %1419 = vmatpush.msra.mxu1 %v1335_v62 }
 0x3cf   : > { %1420 = vmatpush.msra.mxu1 %v1331_v19 }
 0x41d   : > { %v1037_v3 = vpop.f32.mrf.mxu1 }
 0x41e   : > { %v1060_v16 = vadd.f32 %v1059_v2, %v1037_v3  ;;  %v1306_v2 = vld [vmem:[%s2234_s9] sm:$0xf] }
 0x422   : > { %v1160_v23 = vpop.f32.mrf.mxu3 }
 0x424   : > { %v1194_v34 = vpop.f32.mrf.mxu0 }
 0x425   : > { %v1092_v17 = vpop.f32.mrf.mxu1 }
 0x426   : > { %v1095_v21 = vadd.f32 %v1092_v17, %v1060_v16  ;;  %v1346_v16 = vld [vmem:[#allocation8 + $0x78] sm:$0xff] }
 0x427   : > { %v1342_v17 = vld [vmem:[#allocation8 + $0x58] sm:$0xff] }
 0x428   : > { %v1129_v29 = vadd.f32 %v1126_v22, %v1095_v21  ;;  %v1333_v21 = vld [vmem:[#allocation8 + $0x10] sm:$0xff]  ;;  %v1334_v22 = vld [vmem:[#allocation8 + $0x18] sm:$0xff] }
 0x429   : > { %1460 = vmatpush.msrb.mxu3 %v1333_v21 }
 0x42a   : > { %v1163_v33 = vadd.f32 %v1160_v23, %v1129_v29 }
 0x42b   : > { %v1262_v25 = vpop.f32.mrf.mxu2 }
 0x42c   : > { %v1197_v38 = vadd.f32 %v1194_v34, %v1163_v33  ;;  %v1296_v48 = vpop.f32.mrf.mxu3  ;;  %v1398_v34 = vperm.slane %v1395_v24, 1 }
 0x42d   : > { %v1228_v39 = vpop.f32.mrf.mxu1 }
 0x42e   : > { %v1231_v42 = vadd.f32 %v1228_v39, %v1197_v38 }
 0x430   : > { %v1265_v46 = vadd.f32 %v1262_v25, %v1231_v42 }
 0x432   : > { %v1299_v52 = vadd.f32 %v1296_v48, %v1265_v46 }
 0x434   : > { %v1304_v56 = vadd.f32 %v1755_v47, %v1299_v52 }
 0x436   : > { %1756 = vtanh.f32 %v1304_v56 }
 0x43c   : > { %v1757_v3 = vpop.eup %1756 }
 0x43d   : > { %1326 = vmatpush.msrb.mxu0 %v1757_v3 }
 0x43e   : > { %1700 = vmatmul.msk.f32.vlgmr.msrb.gmra.mxu0 %vm1307_vm8, %v1306_v2 }
 0x43f   : > { %1465 = vmatpush.msra.mxu0 %v1394_v4 }
 0x441   : > { %1466 = vmatpush.msra.mxu0 %v1390_v5 }
 0x443   : > { %1467 = vmatpush.msra.mxu0 %v1386_v7 }
 0x445   : > { %1468 = vmatpush.msra.mxu0 %v1382_v8 }
 0x447   : > { %1469 = vmatpush.msra.mxu0 %v1378_v9 }
 0x449   : > { %1470 = vmatpush.msra.mxu0 %v1374_v10 }
 0x44b   : > { %1471 = vmatpush.msra.mxu0 %v1370_v11 }
 0x44d   : > { %1472 = vmatpush.msra.mxu0 %v1366_v12 }
 0x44f   : > { %1473 = vmatpush.msra.mxu0 %v1362_v13 }
 0x451   : > { %1474 = vmatpush.msra.mxu0 %v1358_v6 }
 0x453   : > { %1475 = vmatpush.msra.mxu0 %v1354_v14 }
 0x455   : > { %1476 = vmatpush.msra.mxu0 %v1350_v15 }
 0x457   : > { %1477 = vmatpush.msra.mxu0 %v1346_v16 }
 0x459   : > { %1478 = vmatpush.msra.mxu0 %v1342_v17 }
 0x45b   : > { %1479 = vmatpush.msra.mxu0 %v1338_v18 }
 0x45d   : > { %1480 = vmatpush.msra.mxu0 %v1334_v22 }
 0x4bb   : > { %v1328_v23 = vpop.f32.mrf.mxu0 }
 0x4bc   : > { %1421 = vmatmul.f32.vlgmr.msra.gmra.mxu1 %v1328_v23  ;;  %1441 = vmatmul.f32.vlgmr.msra.gmra.mxu2 %v1328_v23 }
 0x4bd   : > { %1461 = vmatmul.f32.vlgmr.msrb.gmra.mxu3 %v1328_v23  ;;  %1481 = vmatmul.f32.vlgmr.msra.gmra.mxu0 %v1328_v23 }
 0x539   : > { %v1422_v29 = vpop.f32.mrf.mxu1 }
 0x53a   : > { %v1423_v30 = vadd.f32 %v1422_v29, %v1397_v27  ;;  %v1482_v31 = vpop.f32.mrf.mxu0 }
 0x53b   : > { %v1483_v32 = vadd.f32 %v1482_v31, %v1400_v28 }
 0x53c   : > { %v1485_v33 = vsub.f32 0.0, %v1423_v30 }
 0x53d   : > { %v1488_v35 = vsub.f32 0.0, %v1483_v32 }
 0x53e   : > { %v1489_v37 = vmul.f32 1.442695, %v1485_v33 }
 0x53f   : > { %v1495_v38 = vmul.f32 1.442695, %v1488_v35  ;;  %v1442_v39 = vpop.f32.mrf.mxu2 }
 0x540   : > { %1758 = vpow2.f32 %v1489_v37  ;;  %v1443_v40 = vadd.f32 %v1442_v39, %v1398_v34  ;;  %v1462_v41 = vpop.f32.mrf.mxu3 }
 0x541   : > { %1760 = vpow2.f32 %v1495_v38  ;;  %v1463_v26 = vadd.f32 %v1462_v41, %v1399_v36 }
 0x542   : > { %v1486_v42 = vsub.f32 0.0, %v1443_v40 }
 0x543   : > { %v1487_v25 = vsub.f32 0.0, %v1463_v26 }
 0x544   : > { %v1491_v43 = vmul.f32 1.442695, %v1486_v42 }
 0x545   : > { %v1493_v44 = vmul.f32 1.442695, %v1487_v25 }
 0x546   : > { %v1759_v45 = vpop.eup %1758  ;;  %1762 = vpow2.f32 %v1491_v43 }
 0x547   : > { %v1761_v46 = vpop.eup %1760  ;;  %v2186_v47 = vadd.f32 1.0, %v1759_v45  ;;  %1764 = vpow2.f32 %v1493_v44 }
 0x548   : > { %v1500_v48 = vadd.f32 1.0, %v1761_v46 }
 0x549   : > { %1766 = vrcp.f32 %v2186_v47  ;;  %vm1506_vm10 = vweird.f32 %v2186_v47  ;;  %v1512_v4 = vand.u32 2147483648, %v2186_v47  ;;  %v1510_v18 = vand.u32 2147483647, %v2186_v47 }
 0x54a   : > { %1768 = vrcp.f32 %v1500_v48  ;;  %v1554_v58 = vand.u32 2147483648, %v1500_v48  ;;  %vm1548_vm12 = vweird.f32 %v1500_v48  ;;  %v1552_v2 = vand.u32 2147483647, %v1500_v48 }
 0x54b   : > { %v1513_v21 = vor.u32 1.1754944e-38, %v1512_v4 }
 0x54c   : > { %v1763_v49 = vpop.eup %1762  ;;  %v1555_v7 = vor.u32 1.1754944e-38, %v1554_v58  ;;  %vm1553_vm0 = vcmp.eq.f32.partialorder %v1552_v2, 8.507059e+37 }
 0x54d   : > { %v1765_v50 = vpop.eup %1764  ;;  %v1498_v51 = vadd.f32 1.0, %v1763_v49 }
 0x54e   : > { %v1499_v52 = vadd.f32 1.0, %v1765_v50 }
 0x54f   : > { %v2189_v53 = vpop.eup %1766  ;;  %1770 = vrcp.f32 %v1498_v51  ;;  %v1524_v9 = vand.u32 2147483647, %v1498_v51  ;;  %v1526_v11 = vand.u32 2147483648, %v1498_v51  ;;  %vm1520_vm3 = vweird.f32 %v1498_v51 }
 0x550   : > { %v1769_v54 = vpop.eup %1768  ;;  %v1502_v55 = vmul.f32 %v2189_v53, %v2186_v47  ;;  %1772 = vrcp.f32 %v1499_v52  ;;  %vm1507_vm14 = vweird.f32 %v2189_v53  ;;  %v1540_v14 = vand.u32 2147483648, %v1499_v52 }
 0x551   : > { %v1544_v56 = vmul.f32 %v1769_v54, %v1500_v48  ;;  %vm1549_vm9 = vweird.f32 %v1769_v54  ;;  %v1538_v16 = vand.u32 2147483647, %v1499_v52  ;;  %vm2206_vm2 = vmor %vm1506_vm10, %vm1507_vm14  ;;  %v1527_v22 = vor.u32 1.1754944e-38, %v1526_v11 }
 0x552   : > { %v1503_v57 = vsub.f32 1.0, %v1502_v55  ;;  %vm2196_vm13 = vmor %vm1548_vm12, %vm1549_vm9  ;;  %vm1534_vm5 = vweird.f32 %v1499_v52  ;;  %vm1525_vm6 = vcmp.eq.f32.partialorder %v1524_v9, 8.507059e+37  ;;  %v1541_v28 = vor.u32 1.1754944e-38, %v1540_v14 }
 0x553   : > { %v1545_v0 = vsub.f32 1.0, %v1544_v56  ;;  %vm1539_vm8 = vcmp.eq.f32.partialorder %v1538_v16, 8.507059e+37  ;;  %vm1511_vm9 = vcmp.eq.f32.partialorder %v1510_v18, 8.507059e+37 }
 0x554   : > { %v1504_v62 = vmul.f32 %v2189_v53, %v1503_v57 }
 0x555   : > { %v1771_v59 = vpop.eup %1770  ;;  %v1546_v60 = vmul.f32 %v1769_v54, %v1545_v0 }
 0x556   : > { %v1773_v61 = vpop.eup %1772  ;;  %v1516_v63 = vmul.f32 %v1771_v59, %v1498_v51  ;;  %v1505_v13 = vadd.f32 %v2189_v53, %v1504_v62  ;;  %vm1521_vm15 = vweird.f32 %v1771_v59 }
 0x557   : > { %v1547_v1 = vadd.f32 %v1769_v54, %v1546_v60  ;;  %v1530_v3 = vmul.f32 %v1773_v61, %v1499_v52  ;;  %vm1535_vm1 = vweird.f32 %v1773_v61  ;;  %vm1522_vm4 = vmor %vm1520_vm3, %vm1521_vm15 }
 0x558   : > { %v1517_v8 = vsub.f32 1.0, %v1516_v63  ;;  %v1509_v24 = vsel %vm2206_vm2, %v2189_v53, %v1505_v13  ;;  %vm1536_vm7 = vmor %vm1534_vm5, %vm1535_vm1 }
 0x559   : > { %v1551_v10 = vsel %vm2196_vm13, %v1769_v54, %v1547_v1  ;;  %v1531_v12 = vsub.f32 1.0, %v1530_v3  ;;  %v1514_v34 = vsel %vm1511_vm9, %v1513_v21, %v1509_v24 }
 0x55a   : > { %v1518_v6 = vmul.f32 %v1771_v59, %v1517_v8  ;;  %v1556_v19 = vsel %vm1553_vm0, %v1555_v7, %v1551_v10 }
 0x55b   : > { %v1532_v15 = vmul.f32 %v1773_v61, %v1531_v12  ;;  %v1562_v29 = vrot.slane %v1556_v19, 4 }
 0x55c   : > { %v1519_v20 = vadd.f32 %v1771_v59, %v1518_v6 }
 0x55d   : > { %v1533_v23 = vadd.f32 %v1773_v61, %v1532_v15 }
 0x55e   : > { %v1523_v27 = vsel %vm1522_vm4, %v1771_v59, %v1519_v20 }
 0x55f   : > { %v1528_v30 = vsel %vm1525_vm6, %v1527_v22, %v1523_v27  ;;  %v1537_v31 = vsel %vm1536_vm7, %v1773_v61, %v1533_v23 }
 0x560   : > { %v1561_v32 = vrot.slane %v1528_v30, 4  ;;  %v1542_v33 = vsel %vm1539_vm8, %v1541_v28, %v1537_v31 }
 0x561   : > { %v1565_v35 = vsel %vm1563_vm11, %v1542_v33, %v1562_v29 }
 0x562   : > { %v1564_v36 = vsel %vm1563_vm11, %v1514_v34, %v1561_v32  ;;  %1569 = vst [vmem:[%s463_s26 + $0x8] sm:$0xff] %v1565_v35 }
 0x563   : > { %1568 = vst [vmem:[%s463_s26] sm:$0xff] %v1564_v36 }
 0x564 PF: > { %s24_s21 = sadd.s32 1, %s1878_s21  }
 0x565   : > { %p21_p7 = scmp.ge.s32.totalorder %s24_s21, 4  }
 0x567   :  { %23 = sbr.rel (!%p21_p7) target bundleno = 2 (0x2), region = 127 }
 0x56c   :  { %1591 = vsyncpa [#allocation5], 1 }
 0x56d   :  { %1593 = vsyncpa [#allocation5 + $0x1], 1 }
 0x56e   :  { %1594 = vsyncpa [#allocation7], 1 }

</bundles_post_ra>
